<compile_context>
chip_gen: v7x
topology: tpu7x:2x2x1
jax: 0.10.0
libtpu: 0.0.40
codegen_flags: <defaults>
</compile_context>

<pallas_src>
import functools

import jax
import jax.numpy as jnp
from jax import lax
from jax.experimental import pallas as pl
from jax.experimental.pallas import tpu as pltpu


def _node_init_kernel(x2_ref, len_ref,
                      win_r_ref, win_z_ref, win_n_ref,
                      bin_r_ref, bin_z_ref, bin_n_ref,
                      whh_r_ref, whh_z_ref, whh_n_ref,
                      bhh_n_ref, wfc_ref, bfc_ref,
                      out_ref, *, T, B):
    H2 = whh_r_ref.shape[0]          # 2 * H   (fwd | bwd halves along the lane axis)
    H = H2 // 2
    NB, ND = out_ref.shape           # node_num * B, node_dim
    N = NB // B

    x2 = x2_ref[...]                 # (T*B, 2*Din): row t*B+b = [x(t,b) | x(T-1-t,b)]
    length = len_ref[...]            # (B, 1) int32

    # ---- hoisted input projections: one matmul per gate for all T steps & both directions ----
    gi_r = jnp.dot(x2, win_r_ref[...], preferred_element_type=jnp.float32) + bin_r_ref[...]
    gi_z = jnp.dot(x2, win_z_ref[...], preferred_element_type=jnp.float32) + bin_z_ref[...]
    gi_n = jnp.dot(x2, win_n_ref[...], preferred_element_type=jnp.float32) + bin_n_ref[...]

    whh_r = whh_r_ref[...]
    whh_z = whh_z_ref[...]
    whh_n = whh_n_ref[...]
    bhh_n = bhh_n_ref[...]

    # True on forward-direction lanes [0, H); backward lanes are [H, 2H).
    fwd_lane = lax.broadcasted_iota(jnp.int32, (B, H2), 1) < H

    # ---- fused bidirectional recurrence: T serial GRU steps (statically unrolled) ----
    h = jnp.zeros((B, H2), jnp.float32)
    h_states = []
    for i in range(T):
        lo = i * B
        gir = gi_r[lo:lo + B]        # (B, 2H): fwd gates for time i | bwd gates for time T-1-i
        giz = gi_z[lo:lo + B]
        gin = gi_n[lo:lo + B]
        gh_r = jnp.dot(h, whh_r, preferred_element_type=jnp.float32)
        gh_z = jnp.dot(h, whh_z, preferred_element_type=jnp.float32)
        gh_n = jnp.dot(h, whh_n, preferred_element_type=jnp.float32)
        r = jax.nn.sigmoid(gir + gh_r)
        z = jax.nn.sigmoid(giz + gh_z)
        n = jnp.tanh(gin + r * (gh_n + bhh_n))
        h_new = (1.0 - z) * n + z * h
        # backward half only advances while its time index (T-1-i) lies in the valid prefix
        upd = jnp.logical_or(fwd_lane, (T - 1 - i) < length)
        h = jnp.where(upd, h_new, h)
        h_states.append(h)

    # ---- realign: h_states[i][:, :H] = h_fwd(i), h_states[i][:, H:] = h_bwd(T-1-i) ----
    feats = []
    for t in range(T):
        f = jnp.where(fwd_lane, h_states[t], h_states[T - 1 - t])   # [h_fwd(t) | h_bwd(t)]
        f = jnp.where(t < length, f, 0.0)                           # zero outputs past length
        feats.append(f)
    feat = jnp.concatenate(feats, axis=0)                           # (T*B, 2H)

    # ---- single post-loop FC + LeakyReLU, one contiguous output store ----
    y = jnp.dot(feat, wfc_ref[...], preferred_element_type=jnp.float32) + bfc_ref[...]
    if N > T:
        pad = jnp.broadcast_to(bfc_ref[...], ((N - T) * B, ND))     # fc(0) rows for padded frames
        y = jnp.concatenate([y, pad], axis=0)                       # (node_num*B, ND)
    out_ref[...] = jnp.where(y > 0, y, 0.01 * y)                    # leaky_relu(slope=0.01)


def _pack_params(params, H):
    """Pack PyTorch-layout GRU/FC weights into block-diagonal, matmul-friendly layouts."""
    Din = params['wih_f'].shape[1]

    def gate(w, g):                       # rows of gate g in a (3H, *) weight
        return w[g * H:(g + 1) * H, :]

    def bgate(b, g):                      # cols of gate g in a (1, 3H) bias
        return b[:, g * H:(g + 1) * H]

    p = {}
    for gidx, name in enumerate(('r', 'z', 'n')):
        win = jnp.zeros((2 * Din, 2 * H), jnp.float32)
        win = win.at[:Din, :H].set(gate(params['wih_f'], gidx).T)
        win = win.at[Din:, H:].set(gate(params['wih_b'], gidx).T)
        p['win_' + name] = win

        whh = jnp.zeros((2 * H, 2 * H), jnp.float32)
        whh = whh.at[:H, :H].set(gate(params['whh_f'], gidx).T)
        whh = whh.at[H:, H:].set(gate(params['whh_b'], gidx).T)
        p['whh_' + name] = whh

    # r/z: fold input + hidden biases; n: only the input bias here (hidden-n bias stays inside r*()).
    for gidx, name in enumerate(('r', 'z')):
        p['bin_' + name] = jnp.concatenate(
            [bgate(params['bih_f'], gidx) + bgate(params['bhh_f'], gidx),
             bgate(params['bih_b'], gidx) + bgate(params['bhh_b'], gidx)], axis=-1)
    p['bin_n'] = jnp.concatenate([bgate(params['bih_f'], 2), bgate(params['bih_b'], 2)], axis=-1)
    p['bhh_n'] = jnp.concatenate([bgate(params['bhh_f'], 2), bgate(params['bhh_b'], 2)], axis=-1)

    p['wfc_t'] = params['wfc'].T          # (2H, ND)
    p['bfc'] = params['bfc']              # (1, ND)
    return p


def node_initializer_forward(x, mask, params, node_num):
    """x: (B, T, input_dim) float32, mask: (B, T) float32 0/1 -> (B, node_num, node_dim)."""
    B, T, Din = x.shape
    ND = params['wfc'].shape[0]
    H = ND // 2
    assert node_num >= T, "node_num must be >= number of frames (kernel assumes N >= T)"

    length = jnp.sum(mask, axis=-1).astype(jnp.int32).reshape(B, 1)

    x_tm = jnp.transpose(x, (1, 0, 2)).astype(jnp.float32)      # time-major (T, B, Din)
    x2 = jnp.concatenate([x_tm, x_tm[::-1]], axis=-1)           # (T, B, 2*Din): [x(t) | x(T-1-t)]
    x2_flat = x2.reshape(T * B, 2 * Din)

    p = _pack_params(params, H)
    args = (x2_flat, length,
            p['win_r'], p['win_z'], p['win_n'],
            p['bin_r'], p['bin_z'], p['bin_n'],
            p['whh_r'], p['whh_z'], p['whh_n'],
            p['bhh_n'], p['wfc_t'], p['bfc'])

    # Toy sizes: everything fits VMEM comfortably; no grid (B=2 gives nothing to shard).
    # TODO(synk): at production B, add a batch grid with dimension_semantics=("parallel",)
    #             so the second TensorCore on v7x is used, and re-check the VMEM footprint.
    vmem = pl.BlockSpec(memory_space=pltpu.MemorySpace.VMEM)
    out_flat = pl.pallas_call(
        functools.partial(_node_init_kernel, T=T, B=B),
        out_shape=jax.ShapeDtypeStruct((node_num * B, ND), jnp.float32),
        in_specs=[vmem] * len(args),
        out_specs=vmem,
    )(*args)

    # row t*B + b -> (b, t)
    return jnp.transpose(out_flat.reshape(node_num, B, ND), (1, 0, 2))


# ----------------------- pure-JAX reference (for verification) -----------------------
def _ref_gru_cell(x_t, h, wih, bih, whh, bhh, H):
    gi = x_t @ wih.T + bih
    gh = h @ whh.T + bhh
    r = jax.nn.sigmoid(gi[:, :H] + gh[:, :H])
    z = jax.nn.sigmoid(gi[:, H:2 * H] + gh[:, H:2 * H])
    n = jnp.tanh(gi[:, 2 * H:] + r * gh[:, 2 * H:])
    return (1.0 - z) * n + z * h


def node_initializer_reference(x, mask, params, node_num):
    B, T, Din = x.shape
    ND = params['wfc'].shape[0]
    H = ND // 2
    length = mask.sum(-1).astype(jnp.int32)

    h = jnp.zeros((B, H), jnp.float32)
    fwd = []
    for t in range(T):
        h = _ref_gru_cell(x[:, t], h, params['wih_f'], params['bih_f'],
                          params['whh_f'], params['bhh_f'], H)
        fwd.append(h)
    fwd = jnp.stack(fwd, axis=1)                           # (B, T, H)

    h = jnp.zeros((B, H), jnp.float32)
    bwd = [None] * T
    for t in range(T - 1, -1, -1):
        cand = _ref_gru_cell(x[:, t], h, params['wih_b'], params['bih_b'],
                             params['whh_b'], params['bhh_b'], H)
        valid = (t < length)[:, None]
        h = jnp.where(valid, cand, h)
        bwd[t] = h
    bwd = jnp.stack(bwd, axis=1)                           # (B, T, H)

    hcat = jnp.concatenate([fwd, bwd], axis=-1)            # (B, T, 2H)
    valid = (jnp.arange(T)[None, :] < length[:, None])[:, :, None]
    hcat = jnp.where(valid, hcat, 0.0)
    padded = jnp.zeros((B, node_num, ND), jnp.float32).at[:, :T].set(hcat)
    y = padded @ params['wfc'].T + params['bfc']
    return jnp.where(y > 0, y, 0.01 * y)


# ----------------------------------- main -----------------------------------
if __name__ == "__main__":
    # NodeInitializer(node_num=12, input_dim=32, node_dim=32, dropout=0.1)
    B, T = 2, 8
    input_dim, node_dim, node_num = 32, 32, 12
    H = node_dim // 2

    key = jax.random.PRNGKey(0)
    ks = jax.random.split(key, 16)

    def w(k, shape, scale=0.1):
        return (scale * jax.random.normal(k, shape)).astype(jnp.float32)

    params = {
        # forward-direction GRU weights (PyTorch layout: (3H, in), gates [r|z|n])
        'wih_f': w(ks[0], (3 * H, input_dim)),
        'whh_f': w(ks[1], (3 * H, H)),
        'bih_f': w(ks[2], (1, 3 * H)),
        'bhh_f': w(ks[3], (1, 3 * H)),
        # backward-direction GRU weights
        'wih_b': w(ks[4], (3 * H, input_dim)),
        'whh_b': w(ks[5], (3 * H, H)),
        'bih_b': w(ks[6], (1, 3 * H)),
        'bhh_b': w(ks[7], (1, 3 * H)),
        # fc: Linear(node_dim, node_dim)
        'wfc': w(ks[8], (node_dim, node_dim)),
        'bfc': w(ks[9], (1, node_dim)),
    }

    x = jax.random.normal(ks[10], (B, T, input_dim), dtype=jnp.float32)
    lengths = jnp.array([8, 5], dtype=jnp.int32)
    mask = (jnp.arange(T)[None, :] < lengths[:, None]).astype(jnp.float32)   # (B, T)

    out = node_initializer_forward(x, mask, params, node_num)
    out = jax.block_until_ready(out)

    ref = jax.block_until_ready(node_initializer_reference(x, mask, params, node_num))

    assert out.shape == (B, node_num, node_dim), out.shape
    assert jnp.allclose(out, ref, rtol=2e-3, atol=2e-3), float(jnp.max(jnp.abs(out - ref)))

    print("KERNEL_OK")
</pallas_src>

<mosaic_0001>
module attributes {stable_mosaic.version = 11 : i64} {
  func.func @_node_init_kernel(%arg0: memref<16x64xf32, #tpu.memory_space<vmem>>, %arg1: memref<2x1xi32, #tpu.memory_space<vmem>>, %arg2: memref<64x32xf32, #tpu.memory_space<vmem>>, %arg3: memref<64x32xf32, #tpu.memory_space<vmem>>, %arg4: memref<64x32xf32, #tpu.memory_space<vmem>>, %arg5: memref<1x32xf32, #tpu.memory_space<vmem>>, %arg6: memref<1x32xf32, #tpu.memory_space<vmem>>, %arg7: memref<1x32xf32, #tpu.memory_space<vmem>>, %arg8: memref<32x32xf32, #tpu.memory_space<vmem>>, %arg9: memref<32x32xf32, #tpu.memory_space<vmem>>, %arg10: memref<32x32xf32, #tpu.memory_space<vmem>>, %arg11: memref<1x32xf32, #tpu.memory_space<vmem>>, %arg12: memref<32x32xf32, #tpu.memory_space<vmem>>, %arg13: memref<1x32xf32, #tpu.memory_space<vmem>>, %arg14: memref<24x32xf32, #tpu.memory_space<vmem>>) attributes {dimension_semantics = [], scalar_prefetch = 0 : i64, scratch_operands = 0 : i64, tpu.core_type = #tpu.core_type<tc>} {
    %c0 = arith.constant 0 : index
    %c0_0 = arith.constant 0 : index
    %0 = vector.load %arg0[%c0, %c0_0] : memref<16x64xf32, #tpu.memory_space<vmem>>, vector<16x64xf32>
    %c0_1 = arith.constant 0 : index
    %c0_2 = arith.constant 0 : index
    %1 = vector.load %arg1[%c0_1, %c0_2] : memref<2x1xi32, #tpu.memory_space<vmem>>, vector<2x1xi32>
    %c0_3 = arith.constant 0 : index
    %c0_4 = arith.constant 0 : index
    %2 = vector.load %arg2[%c0_3, %c0_4] : memref<64x32xf32, #tpu.memory_space<vmem>>, vector<64x32xf32>
    %cst = arith.constant dense<0.000000e+00> : vector<16x32xf32>
    %3 = tpu.matmul %0, %2, %cst {dimension_numbers = #tpu.dot_dimension_numbers<[1], [0], [0], [1], [0, 0, 1, 1], [], []>} : vector<16x64xf32>, vector<64x32xf32>, vector<16x32xf32> -> vector<16x32xf32>
    %c0_5 = arith.constant 0 : index
    %c0_6 = arith.constant 0 : index
    %4 = vector.load %arg5[%c0_5, %c0_6] : memref<1x32xf32, #tpu.memory_space<vmem>>, vector<1x32xf32>
    %5 = vector.broadcast %4 : vector<1x32xf32> to vector<16x32xf32>
    %6 = arith.addf %3, %5 : vector<16x32xf32>
    %c0_7 = arith.constant 0 : index
    %c0_8 = arith.constant 0 : index
    %7 = vector.load %arg3[%c0_7, %c0_8] : memref<64x32xf32, #tpu.memory_space<vmem>>, vector<64x32xf32>
    %cst_9 = arith.constant dense<0.000000e+00> : vector<16x32xf32>
    %8 = tpu.matmul %0, %7, %cst_9 {dimension_numbers = #tpu.dot_dimension_numbers<[1], [0], [0], [1], [0, 0, 1, 1], [], []>} : vector<16x64xf32>, vector<64x32xf32>, vector<16x32xf32> -> vector<16x32xf32>
    %c0_10 = arith.constant 0 : index
    %c0_11 = arith.constant 0 : index
    %9 = vector.load %arg6[%c0_10, %c0_11] : memref<1x32xf32, #tpu.memory_space<vmem>>, vector<1x32xf32>
    %10 = vector.broadcast %9 : vector<1x32xf32> to vector<16x32xf32>
    %11 = arith.addf %8, %10 : vector<16x32xf32>
    %c0_12 = arith.constant 0 : index
    %c0_13 = arith.constant 0 : index
    %12 = vector.load %arg4[%c0_12, %c0_13] : memref<64x32xf32, #tpu.memory_space<vmem>>, vector<64x32xf32>
    %cst_14 = arith.constant dense<0.000000e+00> : vector<16x32xf32>
    %13 = tpu.matmul %0, %12, %cst_14 {dimension_numbers = #tpu.dot_dimension_numbers<[1], [0], [0], [1], [0, 0, 1, 1], [], []>} : vector<16x64xf32>, vector<64x32xf32>, vector<16x32xf32> -> vector<16x32xf32>
    %c0_15 = arith.constant 0 : index
    %c0_16 = arith.constant 0 : index
    %14 = vector.load %arg7[%c0_15, %c0_16] : memref<1x32xf32, #tpu.memory_space<vmem>>, vector<1x32xf32>
    %15 = vector.broadcast %14 : vector<1x32xf32> to vector<16x32xf32>
    %16 = arith.addf %13, %15 : vector<16x32xf32>
    %c0_17 = arith.constant 0 : index
    %c0_18 = arith.constant 0 : index
    %17 = vector.load %arg8[%c0_17, %c0_18] : memref<32x32xf32, #tpu.memory_space<vmem>>, vector<32x32xf32>
    %c0_19 = arith.constant 0 : index
    %c0_20 = arith.constant 0 : index
    %18 = vector.load %arg9[%c0_19, %c0_20] : memref<32x32xf32, #tpu.memory_space<vmem>>, vector<32x32xf32>
    %c0_21 = arith.constant 0 : index
    %c0_22 = arith.constant 0 : index
    %19 = vector.load %arg10[%c0_21, %c0_22] : memref<32x32xf32, #tpu.memory_space<vmem>>, vector<32x32xf32>
    %c0_23 = arith.constant 0 : index
    %c0_24 = arith.constant 0 : index
    %20 = vector.load %arg11[%c0_23, %c0_24] : memref<1x32xf32, #tpu.memory_space<vmem>>, vector<1x32xf32>
    %21 = tpu.iota {dimensions = array<i32: 1>} : vector<2x32xi32>
    %c16_i32 = arith.constant 16 : i32
    %22 = vector.broadcast %c16_i32 : i32 to vector<2x32xi32>
    %23 = arith.cmpi slt, %21, %22 : vector<2x32xi32>
    %cst_25 = arith.constant 0.000000e+00 : f32
    %24 = vector.broadcast %cst_25 : f32 to vector<2x32xf32>
    %25 = vector.extract_strided_slice %6 {offsets = [0, 0], sizes = [2, 32], strides = [1, 1]} : vector<16x32xf32> to vector<2x32xf32>
    %26 = vector.extract_strided_slice %11 {offsets = [0, 0], sizes = [2, 32], strides = [1, 1]} : vector<16x32xf32> to vector<2x32xf32>
    %27 = vector.extract_strided_slice %16 {offsets = [0, 0], sizes = [2, 32], strides = [1, 1]} : vector<16x32xf32> to vector<2x32xf32>
    %cst_26 = arith.constant dense<0.000000e+00> : vector<2x32xf32>
    %28 = tpu.matmul %24, %17, %cst_26 {dimension_numbers = #tpu.dot_dimension_numbers<[1], [0], [0], [1], [0, 0, 1, 1], [], []>} : vector<2x32xf32>, vector<32x32xf32>, vector<2x32xf32> -> vector<2x32xf32>
    %cst_27 = arith.constant dense<0.000000e+00> : vector<2x32xf32>
    %29 = tpu.matmul %24, %18, %cst_27 {dimension_numbers = #tpu.dot_dimension_numbers<[1], [0], [0], [1], [0, 0, 1, 1], [], []>} : vector<2x32xf32>, vector<32x32xf32>, vector<2x32xf32> -> vector<2x32xf32>
    %cst_28 = arith.constant dense<0.000000e+00> : vector<2x32xf32>
    %30 = tpu.matmul %24, %19, %cst_28 {dimension_numbers = #tpu.dot_dimension_numbers<[1], [0], [0], [1], [0, 0, 1, 1], [], []>} : vector<2x32xf32>, vector<32x32xf32>, vector<2x32xf32> -> vector<2x32xf32>
    %31 = arith.addf %25, %28 : vector<2x32xf32>
    %32 = arith.negf %31 : vector<2x32xf32>
    %33 = math.exp %32 : vector<2x32xf32>
    %cst_29 = arith.constant 1.000000e+00 : f32
    %34 = vector.broadcast %cst_29 : f32 to vector<2x32xf32>
    %35 = arith.addf %34, %33 : vector<2x32xf32>
    %36 = arith.divf %34, %35 : vector<2x32xf32>
    %37 = arith.addf %26, %29 : vector<2x32xf32>
    %38 = arith.negf %37 : vector<2x32xf32>
    %39 = math.exp %38 : vector<2x32xf32>
    %cst_30 = arith.constant 1.000000e+00 : f32
    %40 = vector.broadcast %cst_30 : f32 to vector<2x32xf32>
    %41 = arith.addf %40, %39 : vector<2x32xf32>
    %42 = arith.divf %40, %41 : vector<2x32xf32>
    %43 = vector.broadcast %20 : vector<1x32xf32> to vector<2x32xf32>
    %44 = arith.addf %30, %43 : vector<2x32xf32>
    %45 = arith.mulf %36, %44 : vector<2x32xf32>
    %46 = arith.addf %27, %45 : vector<2x32xf32>
    %47 = math.tanh %46 : vector<2x32xf32>
    %cst_31 = arith.constant 1.000000e+00 : f32
    %48 = vector.broadcast %cst_31 : f32 to vector<2x32xf32>
    %49 = arith.subf %48, %42 : vector<2x32xf32>
    %50 = arith.mulf %49, %47 : vector<2x32xf32>
    %51 = arith.mulf %42, %24 : vector<2x32xf32>
    %52 = arith.addf %50, %51 : vector<2x32xf32>
    %c7_i32 = arith.constant 7 : i32
    %53 = vector.broadcast %c7_i32 : i32 to vector<2x1xi32>
    %54 = arith.cmpi sgt, %1, %53 : vector<2x1xi32>
    %55 = vector.broadcast %54 : vector<2x1xi1> to vector<2x32xi1>
    %56 = arith.ori %23, %55 : vector<2x32xi1>
    %57 = arith.select %56, %52, %24 : vector<2x32xi1>, vector<2x32xf32>
    %58 = vector.extract_strided_slice %6 {offsets = [2, 0], sizes = [2, 32], strides = [1, 1]} : vector<16x32xf32> to vector<2x32xf32>
    %59 = vector.extract_strided_slice %11 {offsets = [2, 0], sizes = [2, 32], strides = [1, 1]} : vector<16x32xf32> to vector<2x32xf32>
    %60 = vector.extract_strided_slice %16 {offsets = [2, 0], sizes = [2, 32], strides = [1, 1]} : vector<16x32xf32> to vector<2x32xf32>
    %cst_32 = arith.constant dense<0.000000e+00> : vector<2x32xf32>
    %61 = tpu.matmul %57, %17, %cst_32 {dimension_numbers = #tpu.dot_dimension_numbers<[1], [0], [0], [1], [0, 0, 1, 1], [], []>} : vector<2x32xf32>, vector<32x32xf32>, vector<2x32xf32> -> vector<2x32xf32>
    %cst_33 = arith.constant dense<0.000000e+00> : vector<2x32xf32>
    %62 = tpu.matmul %57, %18, %cst_33 {dimension_numbers = #tpu.dot_dimension_numbers<[1], [0], [0], [1], [0, 0, 1, 1], [], []>} : vector<2x32xf32>, vector<32x32xf32>, vector<2x32xf32> -> vector<2x32xf32>
    %cst_34 = arith.constant dense<0.000000e+00> : vector<2x32xf32>
    %63 = tpu.matmul %57, %19, %cst_34 {dimension_numbers = #tpu.dot_dimension_numbers<[1], [0], [0], [1], [0, 0, 1, 1], [], []>} : vector<2x32xf32>, vector<32x32xf32>, vector<2x32xf32> -> vector<2x32xf32>
    %64 = arith.addf %58, %61 : vector<2x32xf32>
    %65 = arith.negf %64 : vector<2x32xf32>
    %66 = math.exp %65 : vector<2x32xf32>
    %cst_35 = arith.constant 1.000000e+00 : f32
    %67 = vector.broadcast %cst_35 : f32 to vector<2x32xf32>
    %68 = arith.addf %67, %66 : vector<2x32xf32>
    %69 = arith.divf %67, %68 : vector<2x32xf32>
    %70 = arith.addf %59, %62 : vector<2x32xf32>
    %71 = arith.negf %70 : vector<2x32xf32>
    %72 = math.exp %71 : vector<2x32xf32>
    %cst_36 = arith.constant 1.000000e+00 : f32
    %73 = vector.broadcast %cst_36 : f32 to vector<2x32xf32>
    %74 = arith.addf %73, %72 : vector<2x32xf32>
    %75 = arith.divf %73, %74 : vector<2x32xf32>
    %76 = vector.broadcast %20 : vector<1x32xf32> to vector<2x32xf32>
    %77 = arith.addf %63, %76 : vector<2x32xf32>
    %78 = arith.mulf %69, %77 : vector<2x32xf32>
    %79 = arith.addf %60, %78 : vector<2x32xf32>
    %80 = math.tanh %79 : vector<2x32xf32>
    %cst_37 = arith.constant 1.000000e+00 : f32
    %81 = vector.broadcast %cst_37 : f32 to vector<2x32xf32>
    %82 = arith.subf %81, %75 : vector<2x32xf32>
    %83 = arith.mulf %82, %80 : vector<2x32xf32>
    %84 = arith.mulf %75, %57 : vector<2x32xf32>
    %85 = arith.addf %83, %84 : vector<2x32xf32>
    %c6_i32 = arith.constant 6 : i32
    %86 = vector.broadcast %c6_i32 : i32 to vector<2x1xi32>
    %87 = arith.cmpi sgt, %1, %86 : vector<2x1xi32>
    %88 = vector.broadcast %87 : vector<2x1xi1> to vector<2x32xi1>
    %89 = arith.ori %23, %88 : vector<2x32xi1>
    %90 = arith.select %89, %85, %57 : vector<2x32xi1>, vector<2x32xf32>
    %91 = vector.extract_strided_slice %6 {offsets = [4, 0], sizes = [2, 32], strides = [1, 1]} : vector<16x32xf32> to vector<2x32xf32>
    %92 = vector.extract_strided_slice %11 {offsets = [4, 0], sizes = [2, 32], strides = [1, 1]} : vector<16x32xf32> to vector<2x32xf32>
    %93 = vector.extract_strided_slice %16 {offsets = [4, 0], sizes = [2, 32], strides = [1, 1]} : vector<16x32xf32> to vector<2x32xf32>
    %cst_38 = arith.constant dense<0.000000e+00> : vector<2x32xf32>
    %94 = tpu.matmul %90, %17, %cst_38 {dimension_numbers = #tpu.dot_dimension_numbers<[1], [0], [0], [1], [0, 0, 1, 1], [], []>} : vector<2x32xf32>, vector<32x32xf32>, vector<2x32xf32> -> vector<2x32xf32>
    %cst_39 = arith.constant dense<0.000000e+00> : vector<2x32xf32>
    %95 = tpu.matmul %90, %18, %cst_39 {dimension_numbers = #tpu.dot_dimension_numbers<[1], [0], [0], [1], [0, 0, 1, 1], [], []>} : vector<2x32xf32>, vector<32x32xf32>, vector<2x32xf32> -> vector<2x32xf32>
    %cst_40 = arith.constant dense<0.000000e+00> : vector<2x32xf32>
    %96 = tpu.matmul %90, %19, %cst_40 {dimension_numbers = #tpu.dot_dimension_numbers<[1], [0], [0], [1], [0, 0, 1, 1], [], []>} : vector<2x32xf32>, vector<32x32xf32>, vector<2x32xf32> -> vector<2x32xf32>
    %97 = arith.addf %91, %94 : vector<2x32xf32>
    %98 = arith.negf %97 : vector<2x32xf32>
    %99 = math.exp %98 : vector<2x32xf32>
    %cst_41 = arith.constant 1.000000e+00 : f32
    %100 = vector.broadcast %cst_41 : f32 to vector<2x32xf32>
    %101 = arith.addf %100, %99 : vector<2x32xf32>
    %102 = arith.divf %100, %101 : vector<2x32xf32>
    %103 = arith.addf %92, %95 : vector<2x32xf32>
    %104 = arith.negf %103 : vector<2x32xf32>
    %105 = math.exp %104 : vector<2x32xf32>
    %cst_42 = arith.constant 1.000000e+00 : f32
    %106 = vector.broadcast %cst_42 : f32 to vector<2x32xf32>
    %107 = arith.addf %106, %105 : vector<2x32xf32>
    %108 = arith.divf %106, %107 : vector<2x32xf32>
    %109 = vector.broadcast %20 : vector<1x32xf32> to vector<2x32xf32>
    %110 = arith.addf %96, %109 : vector<2x32xf32>
    %111 = arith.mulf %102, %110 : vector<2x32xf32>
    %112 = arith.addf %93, %111 : vector<2x32xf32>
    %113 = math.tanh %112 : vector<2x32xf32>
    %cst_43 = arith.constant 1.000000e+00 : f32
    %114 = vector.broadcast %cst_43 : f32 to vector<2x32xf32>
    %115 = arith.subf %114, %108 : vector<2x32xf32>
    %116 = arith.mulf %115, %113 : vector<2x32xf32>
    %117 = arith.mulf %108, %90 : vector<2x32xf32>
    %118 = arith.addf %116, %117 : vector<2x32xf32>
    %c5_i32 = arith.constant 5 : i32
    %119 = vector.broadcast %c5_i32 : i32 to vector<2x1xi32>
    %120 = arith.cmpi sgt, %1, %119 : vector<2x1xi32>
    %121 = vector.broadcast %120 : vector<2x1xi1> to vector<2x32xi1>
    %122 = arith.ori %23, %121 : vector<2x32xi1>
    %123 = arith.select %122, %118, %90 : vector<2x32xi1>, vector<2x32xf32>
    %124 = vector.extract_strided_slice %6 {offsets = [6, 0], sizes = [2, 32], strides = [1, 1]} : vector<16x32xf32> to vector<2x32xf32>
    %125 = vector.extract_strided_slice %11 {offsets = [6, 0], sizes = [2, 32], strides = [1, 1]} : vector<16x32xf32> to vector<2x32xf32>
    %126 = vector.extract_strided_slice %16 {offsets = [6, 0], sizes = [2, 32], strides = [1, 1]} : vector<16x32xf32> to vector<2x32xf32>
    %cst_44 = arith.constant dense<0.000000e+00> : vector<2x32xf32>
    %127 = tpu.matmul %123, %17, %cst_44 {dimension_numbers = #tpu.dot_dimension_numbers<[1], [0], [0], [1], [0, 0, 1, 1], [], []>} : vector<2x32xf32>, vector<32x32xf32>, vector<2x32xf32> -> vector<2x32xf32>
    %cst_45 = arith.constant dense<0.000000e+00> : vector<2x32xf32>
    %128 = tpu.matmul %123, %18, %cst_45 {dimension_numbers = #tpu.dot_dimension_numbers<[1], [0], [0], [1], [0, 0, 1, 1], [], []>} : vector<2x32xf32>, vector<32x32xf32>, vector<2x32xf32> -> vector<2x32xf32>
    %cst_46 = arith.constant dense<0.000000e+00> : vector<2x32xf32>
    %129 = tpu.matmul %123, %19, %cst_46 {dimension_numbers = #tpu.dot_dimension_numbers<[1], [0], [0], [1], [0, 0, 1, 1], [], []>} : vector<2x32xf32>, vector<32x32xf32>, vector<2x32xf32> -> vector<2x32xf32>
    %130 = arith.addf %124, %127 : vector<2x32xf32>
    %131 = arith.negf %130 : vector<2x32xf32>
    %132 = math.exp %131 : vector<2x32xf32>
    %cst_47 = arith.constant 1.000000e+00 : f32
    %133 = vector.broadcast %cst_47 : f32 to vector<2x32xf32>
    %134 = arith.addf %133, %132 : vector<2x32xf32>
    %135 = arith.divf %133, %134 : vector<2x32xf32>
    %136 = arith.addf %125, %128 : vector<2x32xf32>
    %137 = arith.negf %136 : vector<2x32xf32>
    %138 = math.exp %137 : vector<2x32xf32>
    %cst_48 = arith.constant 1.000000e+00 : f32
    %139 = vector.broadcast %cst_48 : f32 to vector<2x32xf32>
    %140 = arith.addf %139, %138 : vector<2x32xf32>
    %141 = arith.divf %139, %140 : vector<2x32xf32>
    %142 = vector.broadcast %20 : vector<1x32xf32> to vector<2x32xf32>
    %143 = arith.addf %129, %142 : vector<2x32xf32>
    %144 = arith.mulf %135, %143 : vector<2x32xf32>
    %145 = arith.addf %126, %144 : vector<2x32xf32>
    %146 = math.tanh %145 : vector<2x32xf32>
    %cst_49 = arith.constant 1.000000e+00 : f32
    %147 = vector.broadcast %cst_49 : f32 to vector<2x32xf32>
    %148 = arith.subf %147, %141 : vector<2x32xf32>
    %149 = arith.mulf %148, %146 : vector<2x32xf32>
    %150 = arith.mulf %141, %123 : vector<2x32xf32>
    %151 = arith.addf %149, %150 : vector<2x32xf32>
    %c4_i32 = arith.constant 4 : i32
    %152 = vector.broadcast %c4_i32 : i32 to vector<2x1xi32>
    %153 = arith.cmpi sgt, %1, %152 : vector<2x1xi32>
    %154 = vector.broadcast %153 : vector<2x1xi1> to vector<2x32xi1>
    %155 = arith.ori %23, %154 : vector<2x32xi1>
    %156 = arith.select %155, %151, %123 : vector<2x32xi1>, vector<2x32xf32>
    %157 = vector.extract_strided_slice %6 {offsets = [8, 0], sizes = [2, 32], strides = [1, 1]} : vector<16x32xf32> to vector<2x32xf32>
    %158 = vector.extract_strided_slice %11 {offsets = [8, 0], sizes = [2, 32], strides = [1, 1]} : vector<16x32xf32> to vector<2x32xf32>
    %159 = vector.extract_strided_slice %16 {offsets = [8, 0], sizes = [2, 32], strides = [1, 1]} : vector<16x32xf32> to vector<2x32xf32>
    %cst_50 = arith.constant dense<0.000000e+00> : vector<2x32xf32>
    %160 = tpu.matmul %156, %17, %cst_50 {dimension_numbers = #tpu.dot_dimension_numbers<[1], [0], [0], [1], [0, 0, 1, 1], [], []>} : vector<2x32xf32>, vector<32x32xf32>, vector<2x32xf32> -> vector<2x32xf32>
    %cst_51 = arith.constant dense<0.000000e+00> : vector<2x32xf32>
    %161 = tpu.matmul %156, %18, %cst_51 {dimension_numbers = #tpu.dot_dimension_numbers<[1], [0], [0], [1], [0, 0, 1, 1], [], []>} : vector<2x32xf32>, vector<32x32xf32>, vector<2x32xf32> -> vector<2x32xf32>
    %cst_52 = arith.constant dense<0.000000e+00> : vector<2x32xf32>
    %162 = tpu.matmul %156, %19, %cst_52 {dimension_numbers = #tpu.dot_dimension_numbers<[1], [0], [0], [1], [0, 0, 1, 1], [], []>} : vector<2x32xf32>, vector<32x32xf32>, vector<2x32xf32> -> vector<2x32xf32>
    %163 = arith.addf %157, %160 : vector<2x32xf32>
    %164 = arith.negf %163 : vector<2x32xf32>
    %165 = math.exp %164 : vector<2x32xf32>
    %cst_53 = arith.constant 1.000000e+00 : f32
    %166 = vector.broadcast %cst_53 : f32 to vector<2x32xf32>
    %167 = arith.addf %166, %165 : vector<2x32xf32>
    %168 = arith.divf %166, %167 : vector<2x32xf32>
    %169 = arith.addf %158, %161 : vector<2x32xf32>
    %170 = arith.negf %169 : vector<2x32xf32>
    %171 = math.exp %170 : vector<2x32xf32>
    %cst_54 = arith.constant 1.000000e+00 : f32
    %172 = vector.broadcast %cst_54 : f32 to vector<2x32xf32>
    %173 = arith.addf %172, %171 : vector<2x32xf32>
    %174 = arith.divf %172, %173 : vector<2x32xf32>
    %175 = vector.broadcast %20 : vector<1x32xf32> to vector<2x32xf32>
    %176 = arith.addf %162, %175 : vector<2x32xf32>
    %177 = arith.mulf %168, %176 : vector<2x32xf32>
    %178 = arith.addf %159, %177 : vector<2x32xf32>
    %179 = math.tanh %178 : vector<2x32xf32>
    %cst_55 = arith.constant 1.000000e+00 : f32
    %180 = vector.broadcast %cst_55 : f32 to vector<2x32xf32>
    %181 = arith.subf %180, %174 : vector<2x32xf32>
    %182 = arith.mulf %181, %179 : vector<2x32xf32>
    %183 = arith.mulf %174, %156 : vector<2x32xf32>
    %184 = arith.addf %182, %183 : vector<2x32xf32>
    %c3_i32 = arith.constant 3 : i32
    %185 = vector.broadcast %c3_i32 : i32 to vector<2x1xi32>
    %186 = arith.cmpi sgt, %1, %185 : vector<2x1xi32>
    %187 = vector.broadcast %186 : vector<2x1xi1> to vector<2x32xi1>
    %188 = arith.ori %23, %187 : vector<2x32xi1>
    %189 = arith.select %188, %184, %156 : vector<2x32xi1>, vector<2x32xf32>
    %190 = vector.extract_strided_slice %6 {offsets = [10, 0], sizes = [2, 32], strides = [1, 1]} : vector<16x32xf32> to vector<2x32xf32>
    %191 = vector.extract_strided_slice %11 {offsets = [10, 0], sizes = [2, 32], strides = [1, 1]} : vector<16x32xf32> to vector<2x32xf32>
    %192 = vector.extract_strided_slice %16 {offsets = [10, 0], sizes = [2, 32], strides = [1, 1]} : vector<16x32xf32> to vector<2x32xf32>
    %cst_56 = arith.constant dense<0.000000e+00> : vector<2x32xf32>
    %193 = tpu.matmul %189, %17, %cst_56 {dimension_numbers = #tpu.dot_dimension_numbers<[1], [0], [0], [1], [0, 0, 1, 1], [], []>} : vector<2x32xf32>, vector<32x32xf32>, vector<2x32xf32> -> vector<2x32xf32>
    %cst_57 = arith.constant dense<0.000000e+00> : vector<2x32xf32>
    %194 = tpu.matmul %189, %18, %cst_57 {dimension_numbers = #tpu.dot_dimension_numbers<[1], [0], [0], [1], [0, 0, 1, 1], [], []>} : vector<2x32xf32>, vector<32x32xf32>, vector<2x32xf32> -> vector<2x32xf32>
    %cst_58 = arith.constant dense<0.000000e+00> : vector<2x32xf32>
    %195 = tpu.matmul %189, %19, %cst_58 {dimension_numbers = #tpu.dot_dimension_numbers<[1], [0], [0], [1], [0, 0, 1, 1], [], []>} : vector<2x32xf32>, vector<32x32xf32>, vector<2x32xf32> -> vector<2x32xf32>
    %196 = arith.addf %190, %193 : vector<2x32xf32>
    %197 = arith.negf %196 : vector<2x32xf32>
    %198 = math.exp %197 : vector<2x32xf32>
    %cst_59 = arith.constant 1.000000e+00 : f32
    %199 = vector.broadcast %cst_59 : f32 to vector<2x32xf32>
    %200 = arith.addf %199, %198 : vector<2x32xf32>
    %201 = arith.divf %199, %200 : vector<2x32xf32>
    %202 = arith.addf %191, %194 : vector<2x32xf32>
    %203 = arith.negf %202 : vector<2x32xf32>
    %204 = math.exp %203 : vector<2x32xf32>
    %cst_60 = arith.constant 1.000000e+00 : f32
    %205 = vector.broadcast %cst_60 : f32 to vector<2x32xf32>
    %206 = arith.addf %205, %204 : vector<2x32xf32>
    %207 = arith.divf %205, %206 : vector<2x32xf32>
    %208 = vector.broadcast %20 : vector<1x32xf32> to vector<2x32xf32>
    %209 = arith.addf %195, %208 : vector<2x32xf32>
    %210 = arith.mulf %201, %209 : vector<2x32xf32>
    %211 = arith.addf %192, %210 : vector<2x32xf32>
    %212 = math.tanh %211 : vector<2x32xf32>
    %cst_61 = arith.constant 1.000000e+00 : f32
    %213 = vector.broadcast %cst_61 : f32 to vector<2x32xf32>
    %214 = arith.subf %213, %207 : vector<2x32xf32>
    %215 = arith.mulf %214, %212 : vector<2x32xf32>
    %216 = arith.mulf %207, %189 : vector<2x32xf32>
    %217 = arith.addf %215, %216 : vector<2x32xf32>
    %c2_i32 = arith.constant 2 : i32
    %218 = vector.broadcast %c2_i32 : i32 to vector<2x1xi32>
    %219 = arith.cmpi sgt, %1, %218 : vector<2x1xi32>
    %220 = vector.broadcast %219 : vector<2x1xi1> to vector<2x32xi1>
    %221 = arith.ori %23, %220 : vector<2x32xi1>
    %222 = arith.select %221, %217, %189 : vector<2x32xi1>, vector<2x32xf32>
    %223 = vector.extract_strided_slice %6 {offsets = [12, 0], sizes = [2, 32], strides = [1, 1]} : vector<16x32xf32> to vector<2x32xf32>
    %224 = vector.extract_strided_slice %11 {offsets = [12, 0], sizes = [2, 32], strides = [1, 1]} : vector<16x32xf32> to vector<2x32xf32>
    %225 = vector.extract_strided_slice %16 {offsets = [12, 0], sizes = [2, 32], strides = [1, 1]} : vector<16x32xf32> to vector<2x32xf32>
    %cst_62 = arith.constant dense<0.000000e+00> : vector<2x32xf32>
    %226 = tpu.matmul %222, %17, %cst_62 {dimension_numbers = #tpu.dot_dimension_numbers<[1], [0], [0], [1], [0, 0, 1, 1], [], []>} : vector<2x32xf32>, vector<32x32xf32>, vector<2x32xf32> -> vector<2x32xf32>
    %cst_63 = arith.constant dense<0.000000e+00> : vector<2x32xf32>
    %227 = tpu.matmul %222, %18, %cst_63 {dimension_numbers = #tpu.dot_dimension_numbers<[1], [0], [0], [1], [0, 0, 1, 1], [], []>} : vector<2x32xf32>, vector<32x32xf32>, vector<2x32xf32> -> vector<2x32xf32>
    %cst_64 = arith.constant dense<0.000000e+00> : vector<2x32xf32>
    %228 = tpu.matmul %222, %19, %cst_64 {dimension_numbers = #tpu.dot_dimension_numbers<[1], [0], [0], [1], [0, 0, 1, 1], [], []>} : vector<2x32xf32>, vector<32x32xf32>, vector<2x32xf32> -> vector<2x32xf32>
    %229 = arith.addf %223, %226 : vector<2x32xf32>
    %230 = arith.negf %229 : vector<2x32xf32>
    %231 = math.exp %230 : vector<2x32xf32>
    %cst_65 = arith.constant 1.000000e+00 : f32
    %232 = vector.broadcast %cst_65 : f32 to vector<2x32xf32>
    %233 = arith.addf %232, %231 : vector<2x32xf32>
    %234 = arith.divf %232, %233 : vector<2x32xf32>
    %235 = arith.addf %224, %227 : vector<2x32xf32>
    %236 = arith.negf %235 : vector<2x32xf32>
    %237 = math.exp %236 : vector<2x32xf32>
    %cst_66 = arith.constant 1.000000e+00 : f32
    %238 = vector.broadcast %cst_66 : f32 to vector<2x32xf32>
    %239 = arith.addf %238, %237 : vector<2x32xf32>
    %240 = arith.divf %238, %239 : vector<2x32xf32>
    %241 = vector.broadcast %20 : vector<1x32xf32> to vector<2x32xf32>
    %242 = arith.addf %228, %241 : vector<2x32xf32>
    %243 = arith.mulf %234, %242 : vector<2x32xf32>
    %244 = arith.addf %225, %243 : vector<2x32xf32>
    %245 = math.tanh %244 : vector<2x32xf32>
    %cst_67 = arith.constant 1.000000e+00 : f32
    %246 = vector.broadcast %cst_67 : f32 to vector<2x32xf32>
    %247 = arith.subf %246, %240 : vector<2x32xf32>
    %248 = arith.mulf %247, %245 : vector<2x32xf32>
    %249 = arith.mulf %240, %222 : vector<2x32xf32>
    %250 = arith.addf %248, %249 : vector<2x32xf32>
    %c1_i32 = arith.constant 1 : i32
    %251 = vector.broadcast %c1_i32 : i32 to vector<2x1xi32>
    %252 = arith.cmpi sgt, %1, %251 : vector<2x1xi32>
    %253 = vector.broadcast %252 : vector<2x1xi1> to vector<2x32xi1>
    %254 = arith.ori %23, %253 : vector<2x32xi1>
    %255 = arith.select %254, %250, %222 : vector<2x32xi1>, vector<2x32xf32>
    %256 = vector.extract_strided_slice %6 {offsets = [14, 0], sizes = [2, 32], strides = [1, 1]} : vector<16x32xf32> to vector<2x32xf32>
    %257 = vector.extract_strided_slice %11 {offsets = [14, 0], sizes = [2, 32], strides = [1, 1]} : vector<16x32xf32> to vector<2x32xf32>
    %258 = vector.extract_strided_slice %16 {offsets = [14, 0], sizes = [2, 32], strides = [1, 1]} : vector<16x32xf32> to vector<2x32xf32>
    %cst_68 = arith.constant dense<0.000000e+00> : vector<2x32xf32>
    %259 = tpu.matmul %255, %17, %cst_68 {dimension_numbers = #tpu.dot_dimension_numbers<[1], [0], [0], [1], [0, 0, 1, 1], [], []>} : vector<2x32xf32>, vector<32x32xf32>, vector<2x32xf32> -> vector<2x32xf32>
    %cst_69 = arith.constant dense<0.000000e+00> : vector<2x32xf32>
    %260 = tpu.matmul %255, %18, %cst_69 {dimension_numbers = #tpu.dot_dimension_numbers<[1], [0], [0], [1], [0, 0, 1, 1], [], []>} : vector<2x32xf32>, vector<32x32xf32>, vector<2x32xf32> -> vector<2x32xf32>
    %cst_70 = arith.constant dense<0.000000e+00> : vector<2x32xf32>
    %261 = tpu.matmul %255, %19, %cst_70 {dimension_numbers = #tpu.dot_dimension_numbers<[1], [0], [0], [1], [0, 0, 1, 1], [], []>} : vector<2x32xf32>, vector<32x32xf32>, vector<2x32xf32> -> vector<2x32xf32>
    %262 = arith.addf %256, %259 : vector<2x32xf32>
    %263 = arith.negf %262 : vector<2x32xf32>
    %264 = math.exp %263 : vector<2x32xf32>
    %cst_71 = arith.constant 1.000000e+00 : f32
    %265 = vector.broadcast %cst_71 : f32 to vector<2x32xf32>
    %266 = arith.addf %265, %264 : vector<2x32xf32>
    %267 = arith.divf %265, %266 : vector<2x32xf32>
    %268 = arith.addf %257, %260 : vector<2x32xf32>
    %269 = arith.negf %268 : vector<2x32xf32>
    %270 = math.exp %269 : vector<2x32xf32>
    %cst_72 = arith.constant 1.000000e+00 : f32
    %271 = vector.broadcast %cst_72 : f32 to vector<2x32xf32>
    %272 = arith.addf %271, %270 : vector<2x32xf32>
    %273 = arith.divf %271, %272 : vector<2x32xf32>
    %274 = vector.broadcast %20 : vector<1x32xf32> to vector<2x32xf32>
    %275 = arith.addf %261, %274 : vector<2x32xf32>
    %276 = arith.mulf %267, %275 : vector<2x32xf32>
    %277 = arith.addf %258, %276 : vector<2x32xf32>
    %278 = math.tanh %277 : vector<2x32xf32>
    %cst_73 = arith.constant 1.000000e+00 : f32
    %279 = vector.broadcast %cst_73 : f32 to vector<2x32xf32>
    %280 = arith.subf %279, %273 : vector<2x32xf32>
    %281 = arith.mulf %280, %278 : vector<2x32xf32>
    %282 = arith.mulf %273, %255 : vector<2x32xf32>
    %283 = arith.addf %281, %282 : vector<2x32xf32>
    %c0_i32 = arith.constant 0 : i32
    %284 = vector.broadcast %c0_i32 : i32 to vector<2x1xi32>
    %285 = arith.cmpi sgt, %1, %284 : vector<2x1xi32>
    %286 = vector.broadcast %285 : vector<2x1xi1> to vector<2x32xi1>
    %287 = arith.ori %23, %286 : vector<2x32xi1>
    %288 = arith.select %287, %283, %255 : vector<2x32xi1>, vector<2x32xf32>
    %289 = arith.select %23, %57, %288 : vector<2x32xi1>, vector<2x32xf32>
    %c0_i32_74 = arith.constant 0 : i32
    %290 = vector.broadcast %c0_i32_74 : i32 to vector<2x1xi32>
    %291 = arith.cmpi sgt, %1, %290 : vector<2x1xi32>
    %cst_75 = arith.constant 0.000000e+00 : f32
    %292 = vector.shape_cast %291 : vector<2x1xi1> to vector<2x1xi1>
    %293 = vector.broadcast %292 : vector<2x1xi1> to vector<2x32xi1>
    %294 = vector.broadcast %cst_75 : f32 to vector<2x32xf32>
    %295 = arith.select %293, %289, %294 : vector<2x32xi1>, vector<2x32xf32>
    %296 = arith.select %23, %90, %255 : vector<2x32xi1>, vector<2x32xf32>
    %c1_i32_76 = arith.constant 1 : i32
    %297 = vector.broadcast %c1_i32_76 : i32 to vector<2x1xi32>
    %298 = arith.cmpi sgt, %1, %297 : vector<2x1xi32>
    %cst_77 = arith.constant 0.000000e+00 : f32
    %299 = vector.shape_cast %298 : vector<2x1xi1> to vector<2x1xi1>
    %300 = vector.broadcast %299 : vector<2x1xi1> to vector<2x32xi1>
    %301 = vector.broadcast %cst_77 : f32 to vector<2x32xf32>
    %302 = arith.select %300, %296, %301 : vector<2x32xi1>, vector<2x32xf32>
    %303 = arith.select %23, %123, %222 : vector<2x32xi1>, vector<2x32xf32>
    %c2_i32_78 = arith.constant 2 : i32
    %304 = vector.broadcast %c2_i32_78 : i32 to vector<2x1xi32>
    %305 = arith.cmpi sgt, %1, %304 : vector<2x1xi32>
    %cst_79 = arith.constant 0.000000e+00 : f32
    %306 = vector.shape_cast %305 : vector<2x1xi1> to vector<2x1xi1>
    %307 = vector.broadcast %306 : vector<2x1xi1> to vector<2x32xi1>
    %308 = vector.broadcast %cst_79 : f32 to vector<2x32xf32>
    %309 = arith.select %307, %303, %308 : vector<2x32xi1>, vector<2x32xf32>
    %310 = arith.select %23, %156, %189 : vector<2x32xi1>, vector<2x32xf32>
    %c3_i32_80 = arith.constant 3 : i32
    %311 = vector.broadcast %c3_i32_80 : i32 to vector<2x1xi32>
    %312 = arith.cmpi sgt, %1, %311 : vector<2x1xi32>
    %cst_81 = arith.constant 0.000000e+00 : f32
    %313 = vector.shape_cast %312 : vector<2x1xi1> to vector<2x1xi1>
    %314 = vector.broadcast %313 : vector<2x1xi1> to vector<2x32xi1>
    %315 = vector.broadcast %cst_81 : f32 to vector<2x32xf32>
    %316 = arith.select %314, %310, %315 : vector<2x32xi1>, vector<2x32xf32>
    %317 = arith.select %23, %189, %156 : vector<2x32xi1>, vector<2x32xf32>
    %c4_i32_82 = arith.constant 4 : i32
    %318 = vector.broadcast %c4_i32_82 : i32 to vector<2x1xi32>
    %319 = arith.cmpi sgt, %1, %318 : vector<2x1xi32>
    %cst_83 = arith.constant 0.000000e+00 : f32
    %320 = vector.shape_cast %319 : vector<2x1xi1> to vector<2x1xi1>
    %321 = vector.broadcast %320 : vector<2x1xi1> to vector<2x32xi1>
    %322 = vector.broadcast %cst_83 : f32 to vector<2x32xf32>
    %323 = arith.select %321, %317, %322 : vector<2x32xi1>, vector<2x32xf32>
    %324 = arith.select %23, %222, %123 : vector<2x32xi1>, vector<2x32xf32>
    %c5_i32_84 = arith.constant 5 : i32
    %325 = vector.broadcast %c5_i32_84 : i32 to vector<2x1xi32>
    %326 = arith.cmpi sgt, %1, %325 : vector<2x1xi32>
    %cst_85 = arith.constant 0.000000e+00 : f32
    %327 = vector.shape_cast %326 : vector<2x1xi1> to vector<2x1xi1>
    %328 = vector.broadcast %327 : vector<2x1xi1> to vector<2x32xi1>
    %329 = vector.broadcast %cst_85 : f32 to vector<2x32xf32>
    %330 = arith.select %328, %324, %329 : vector<2x32xi1>, vector<2x32xf32>
    %331 = arith.select %23, %255, %90 : vector<2x32xi1>, vector<2x32xf32>
    %c6_i32_86 = arith.constant 6 : i32
    %332 = vector.broadcast %c6_i32_86 : i32 to vector<2x1xi32>
    %333 = arith.cmpi sgt, %1, %332 : vector<2x1xi32>
    %cst_87 = arith.constant 0.000000e+00 : f32
    %334 = vector.shape_cast %333 : vector<2x1xi1> to vector<2x1xi1>
    %335 = vector.broadcast %334 : vector<2x1xi1> to vector<2x32xi1>
    %336 = vector.broadcast %cst_87 : f32 to vector<2x32xf32>
    %337 = arith.select %335, %331, %336 : vector<2x32xi1>, vector<2x32xf32>
    %338 = arith.select %23, %288, %57 : vector<2x32xi1>, vector<2x32xf32>
    %c7_i32_88 = arith.constant 7 : i32
    %339 = vector.broadcast %c7_i32_88 : i32 to vector<2x1xi32>
    %340 = arith.cmpi sgt, %1, %339 : vector<2x1xi32>
    %cst_89 = arith.constant 0.000000e+00 : f32
    %341 = vector.shape_cast %340 : vector<2x1xi1> to vector<2x1xi1>
    %342 = vector.broadcast %341 : vector<2x1xi1> to vector<2x32xi1>
    %343 = vector.broadcast %cst_89 : f32 to vector<2x32xf32>
    %344 = arith.select %342, %338, %343 : vector<2x32xi1>, vector<2x32xf32>
    %345 = tpu.concatenate %295, %302, %309, %316, %323, %330, %337, %344 in 0 : vector<2x32xf32>, vector<2x32xf32>, vector<2x32xf32>, vector<2x32xf32>, vector<2x32xf32>, vector<2x32xf32>, vector<2x32xf32>, vector<2x32xf32> -> vector<16x32xf32>
    %c0_90 = arith.constant 0 : index
    %c0_91 = arith.constant 0 : index
    %346 = vector.load %arg12[%c0_90, %c0_91] : memref<32x32xf32, #tpu.memory_space<vmem>>, vector<32x32xf32>
    %cst_92 = arith.constant dense<0.000000e+00> : vector<16x32xf32>
    %347 = tpu.matmul %345, %346, %cst_92 {dimension_numbers = #tpu.dot_dimension_numbers<[1], [0], [0], [1], [0, 0, 1, 1], [], []>} : vector<16x32xf32>, vector<32x32xf32>, vector<16x32xf32> -> vector<16x32xf32>
    %c0_93 = arith.constant 0 : index
    %c0_94 = arith.constant 0 : index
    %348 = vector.load %arg13[%c0_93, %c0_94] : memref<1x32xf32, #tpu.memory_space<vmem>>, vector<1x32xf32>
    %349 = vector.broadcast %348 : vector<1x32xf32> to vector<16x32xf32>
    %350 = arith.addf %347, %349 : vector<16x32xf32>
    %c0_95 = arith.constant 0 : index
    %c0_96 = arith.constant 0 : index
    %351 = vector.load %arg13[%c0_95, %c0_96] : memref<1x32xf32, #tpu.memory_space<vmem>>, vector<1x32xf32>
    %352 = vector.shape_cast %351 : vector<1x32xf32> to vector<1x32xf32>
    %353 = vector.broadcast %352 : vector<1x32xf32> to vector<8x32xf32>
    %354 = tpu.concatenate %350, %353 in 0 : vector<16x32xf32>, vector<8x32xf32> -> vector<24x32xf32>
    %cst_97 = arith.constant 0.000000e+00 : f32
    %355 = vector.broadcast %cst_97 : f32 to vector<24x32xf32>
    %356 = arith.cmpf ogt, %354, %355 : vector<24x32xf32>
    %cst_98 = arith.constant 0.00999999977 : f32
    %357 = vector.broadcast %cst_98 : f32 to vector<24x32xf32>
    %358 = arith.mulf %357, %354 : vector<24x32xf32>
    %359 = arith.select %356, %354, %358 : vector<24x32xi1>, vector<24x32xf32>
    %c0_99 = arith.constant 0 : index
    %c0_100 = arith.constant 0 : index
    %360 = vector.load %arg14[%c0_99, %c0_100] : memref<24x32xf32, #tpu.memory_space<vmem>>, vector<24x32xf32>
    tpu.vector_store %arg14[%c0_99, %c0_100], %359 {strides = array<i32>} : memref<24x32xf32, #tpu.memory_space<vmem>>, vector<24x32xf32>,
    return
  }
}

</mosaic_0001>

<bundles_post_ra>
// kernel: tpu_custom_call.1
= control target key start
LH: loop header
LB: loop body
LE: loop exit
PB: predicated region body
PF: predicated region fallthrough
CT: control target
= control target key end

     0   :  { %v3385_v12 = vmov 0   ;;  %vm66_vm0 = vcmask 523264   ;;  %s4034_s0 = inlined_call_operand.vmem [shape: f32[16,64], index: 0, kind: input, shape index: {}]   ;;  %s4035_s1 = inlined_call_operand.vmem [shape: s32[2,1], index: 1, kind: input, shape index: {}]   ;;  %s4036_s2 = inlined_call_operand.vmem [shape: f32[64,32], index: 2, kind: input, shape index: {}]   ;;  %s4037_s3 = inlined_call_operand.vmem [shape: f32[64,32], index: 3, kind: input, shape index: {}]   ;;  %s4038_s4 = inlined_call_operand.vmem [shape: f32[64,32], index: 4, kind: input, shape index: {}]   ;;  %s4039_s5 = inlined_call_operand.vmem [shape: f32[1,32], index: 5, kind: input, shape index: {}]   ;;  %s4040_s6 = inlined_call_operand.vmem [shape: f32[1,32], index: 6, kind: input, shape index: {}]   ;;  %s4041_s7 = inlined_call_operand.vmem [shape: f32[1,32], index: 7, kind: input, shape index: {}]   ;;  %s4042_s8 = inlined_call_operand.vmem [shape: f32[32,32], index: 8, kind: input, shape index: {}]   ;;  %s4043_s9 = inlined_call_operand.vmem [shape: f32[32,32], index: 9, kind: input, shape index: {}]   ;;  %s4044_s10 = inlined_call_operand.vmem [shape: f32[32,32], index: 10, kind: input, shape index: {}]   ;;  %s4045_s11 = inlined_call_operand.vmem [shape: f32[1,32], index: 11, kind: input, shape index: {}]   ;;  %s4046_s12 = inlined_call_operand.vmem [shape: f32[32,32], index: 12, kind: input, shape index: {}]   ;;  %s4047_s13 = inlined_call_operand.vmem [shape: f32[1,32], index: 13, kind: input, shape index: {}]   ;;  %s4048_s14 = inlined_call_operand.hbm [shape: f32[24,32], index: 14, kind: output, shape index: {}]  }
   0x1   :  { %v148_v0 = vld [vmem:[%s4037_s3] sm:$0xff]  ;;  %v149_v1 = vld [vmem:[%s4037_s3 + $0x8] sm:$0xff]  ;;  %v150_v5 = vld [vmem:[%s4037_s3 + $0x10] sm:$0xff]  ;;  %3279 = vset.pattern.permute.xlu0 %v3385_v12  ;;  %3280 = vset.pattern.permute.xlu1 %v3385_v12 }
   0x2   :  { %v51_v2 = vld [vmem:[%s4036_s2] sm:$0xff]  ;;  %v3088_v3 = vpack.c.bf16 %v149_v1, %v148_v0  ;;  %v52_v4 = vld [vmem:[%s4036_s2 + $0x8] sm:$0xff]  ;;  %v151_v6 = vld [vmem:[%s4037_s3 + $0x18] sm:$0xff] }
   0x3   :  { %v3072_v7 = vpack.c.bf16 %v52_v4, %v51_v2  ;;  %v3092_v8 = vpack.c.bf16 %v151_v6, %v150_v5  ;;  %v53_v9 = vld [vmem:[%s4036_s2 + $0x10] sm:$0xff]  ;;  %v54_v10 = vld [vmem:[%s4036_s2 + $0x18] sm:$0xff]  ;;  %v152_v11 = vld [vmem:[%s4037_s3 + $0x20] sm:$0xff] }
   0x4   :  { %3089 = vmatprep.subr.bf16.mxu1 %v3088_v3  ;;  %v3076_v13 = vpack.c.bf16 %v54_v10, %v53_v9  ;;  %v153_v14 = vld [vmem:[%s4037_s3 + $0x28] sm:$0xff]  ;;  %v55_v15 = vld [vmem:[%s4036_s2 + $0x20] sm:$0xff]  ;;  %v154_v20 = vld [vmem:[%s4037_s3 + $0x30] sm:$0xff] }
   0x5   :  { %v56_v16 = vld [vmem:[%s4036_s2 + $0x28] sm:$0xff]  ;;  %3091 = vmatpush3.bf16.msra.mxu1 %v3088_v3  ;;  %3073 = vmatprep.subr.bf16.mxu0 %v3072_v7  ;;  %v48_v17 = vld [vmem:[%s4034_s0] sm:$0xff]  ;;  %v3096_v18 = vpack.c.bf16 %v153_v14, %v152_v11  ;;  %v155_v21 = vld [vmem:[%s4037_s3 + $0x38] sm:$0xff] }
   0x6   :  { %3093 = vmatprep.subr.bf16.mxu1 %v3092_v8  ;;  %3075 = vmatpush3.bf16.msra.mxu0 %v3072_v7  ;;  %v3080_v19 = vpack.c.bf16 %v56_v16, %v55_v15  ;;  %v57_v22 = vld [vmem:[%s4036_s2 + $0x30] sm:$0xff]  ;;  %v58_v23 = vld [vmem:[%s4036_s2 + $0x38] sm:$0xff]  ;;  %v3100_v24 = vpack.c.bf16 %v155_v21, %v154_v20  ;;  %v238_v26 = vld [vmem:[%s4038_s4] sm:$0xff] }
   0x7   :  { %3077 = vmatprep.subr.bf16.mxu0 %v3076_v13  ;;  %2775 = vmatprep.mubr.msk.f32.mxu1 %vm66_vm0, %v48_v17  ;;  %v3084_v25 = vpack.c.bf16 %v58_v23, %v57_v22  ;;  %v239_v27 = vld [vmem:[%s4038_s4 + $0x8] sm:$0xff]  ;;  %v3531_v28 = vld [vmem:[%s4035_s1] sm:$0x3] }
   0x8   :  { %2756 = vmatprep.mubr.msk.f32.mxu0 %vm66_vm0, %v48_v17  ;;  %v328_v29 = vld [vmem:[%s4042_s8] sm:$0xff]  ;;  %v329_v30 = vld [vmem:[%s4042_s8 + $0x8] sm:$0xff]  ;;  %vm585_vm1 = vcmp.gt.s32.totalorder %v3531_v28, 7  ;;  %vm838_vm2 = vcmp.gt.s32.totalorder %v3531_v28, 6 }
   0x9   :  { %3095 = vmatpush3.bf16.msra.mxu1 %v3092_v8 }
   0xa   :  { %3097 = vmatprep.subr.bf16.mxu1 %v3096_v18  ;;  %3079 = vmatpush3.bf16.msra.mxu0 %v3076_v13 }
   0xb   :  { %3081 = vmatprep.subr.bf16.mxu0 %v3080_v19 }
   0xd   :  { %3099 = vmatpush3.bf16.msra.mxu1 %v3096_v18 }
   0xe   :  { %3101 = vmatprep.subr.bf16.mxu1 %v3100_v24  ;;  %3083 = vmatpush3.bf16.msra.mxu0 %v3080_v19 }
   0xf   :  { %19 = vsyncpa [#allocation3], 0  ;;  %3085 = vmatprep.subr.bf16.mxu0 %v3084_v25  ;;  %v3104_v31 = vpack.c.bf16 %v239_v27, %v238_v26  ;;  %v586_v32 = vsel %vm585_vm1, 1, %v3385_v12  ;;  %v3545_v33 = vld [vmem:[%s4034_s0 + $0x8] sm:$0xff]  ;;  %v3547_v34 = vpack.c.bf16 %v329_v30, %v328_v29  ;;  %v240_v35 = vld [vmem:[%s4038_s4 + $0x10] sm:$0xff]  ;;  %v839_v37 = vsel %vm838_vm2, 1, %v3385_v12 }
  0x10   :  { %588 = vperm.xlu0 %3279, %v586_v32   ;;  %v241_v36 = vld [vmem:[%s4038_s4 + $0x18] sm:$0xff]  ;;  %v3386_v38 = vmov 0.0|0.0   ;;  %v330_v39 = vld [vmem:[%s4042_s8 + $0x10] sm:$0xff]  ;;  %vm1595_vm3 = vcmp.gt.s32.totalorder %v3531_v28, 3  ;;  %v242_v43 = vld [vmem:[%s4038_s4 + $0x20] sm:$0xff]  ;;  %vm3387_vm4 = vmmov 0  }
  0x11   :  { %3103 = vmatpush3.bf16.msra.mxu1 %v3100_v24  ;;  %v331_v40 = vld [vmem:[%s4042_s8 + $0x18] sm:$0xff]  ;;  %v3108_v41 = vpack.c.bf16 %v241_v36, %v240_v35  ;;  %v243_v44 = vld [vmem:[%s4038_s4 + $0x28] sm:$0xff]  ;;  %v1596_v45 = vsel %vm1595_vm3, 1, %v3385_v12  ;;  %v3388_v46 = vmov 0.0   ;;  %v332_v47 = vld [vmem:[%s4043_s9] sm:$0xff]  ;;  %vm2104_vm5 = vcmp.gt.s32.totalorder %v3531_v28, 1 }
  0x12   :  { %3120 = vmatprep.subr.bf16.mxu1 %v3386_v38  ;;  %3087 = vmatpush3.bf16.msra.mxu0 %v3084_v25  ;;  %v3569_v42 = vpack.c.bf16 %v331_v40, %v330_v39  ;;  %v333_v48 = vld [vmem:[%s4043_s9 + $0x8] sm:$0xff]  ;;  %v3112_v49 = vpack.c.bf16 %v243_v44, %v242_v43  ;;  %v244_v51 = vld [vmem:[%s4038_s4 + $0x30] sm:$0xff]  ;;  %v245_v52 = vld [vmem:[%s4038_s4 + $0x38] sm:$0xff]  ;;  %v2105_v55 = vsel %vm2104_vm5, 1, %v3385_v12  ;;  %vm344_vm9 = vcmask 261120   ;;  %s3389_s24 = smov [#allocation2]  }
  0x13   :  { %3105 = vmatprep.subr.bf16.mxu0 %v3104_v31  ;;  %v3590_v50 = vpack.c.bf16 %v333_v48, %v332_v47  ;;  %v334_v53 = vld [vmem:[%s4043_s9 + $0x10] sm:$0xff]  ;;  %v335_v54 = vld [vmem:[%s4043_s9 + $0x18] sm:$0xff]  ;;  %v3116_v56 = vpack.c.bf16 %v245_v52, %v244_v51  ;;  %v336_v58 = vld [vmem:[%s4044_s10] sm:$0xff]  ;;  %vm1094_vm10 = vcmp.gt.s32.totalorder %v3531_v28, 5  ;;  %vm1350_vm11 = vcmp.gt.s32.totalorder %v3531_v28, 4  ;;  %s2523_s25 = sshll.u32 %s3389_s24, 4  ;;  %s2524_s25 = int_to_ptr.vmem [resolvable:$true] %s2523_s25 }
  0x14   :  { %2776 = vmatmul.mubr.msk.f32.vlgmr.msra.gmra.mrb[0].mxu1 %vm66_vm0, %v3545_v33  ;;  %841 = vperm.xlu0 %3279, %v839_v37   ;;  %v3608_v57 = vpack.c.bf16 %v335_v54, %v334_v53  ;;  %v337_v59 = vld [vmem:[%s4044_s10 + $0x8] sm:$0xff]  ;;  %v338_v61 = vld [vmem:[%s4044_s10 + $0x10] sm:$0xff]  ;;  %v339_v62 = vld [vmem:[%s4044_s10 + $0x18] sm:$0xff]  ;;  %v341_v37 = vlaneseq  ;;  %v1095_v51 = vsel %vm1094_vm10, 1, %v3385_v12  ;;  %v1351_v52 = vsel %vm1350_vm11, 1, %v3385_v12  ;;  %p3366_p1 = scmp.lt.s32.totalorder %s2524_s25, %s2524_s25 }
  0x15   :  { %3122 = vmatpush3.bf16.msra.mxu1 %v3547_v34  ;;  %2757 = vmatmul.mubr.msk.f32.vlgmr.msra.gmra.mrb[0].mxu0 %vm66_vm0, %v3545_v33  ;;  %v3621_v60 = vpack.c.bf16 %v337_v59, %v336_v58  ;;  %v3638_v63 = vpack.c.bf16 %v339_v62, %v338_v61  ;;  %v2537_v0 = vld [vmem:[%s4040_s6] ss:$0 sm:$0xff]  ;;  %vm1848_vm12 = vcmp.gt.s32.totalorder %v3531_v28, 2  ;;  %vm2360_vm13 = vcmp.gt.s32.totalorder %v3531_v28, 0 }
  0x16   :  { %3123 = vmatprep.subr.bf16.mxu1 %v3386_v38  ;;  %2805 = vmatprep.mubr.msk.f32.mxu1 %vm3387_vm4, %v3388_v46  ;;  %v2534_v1 = vld [vmem:[%s4039_s5] ss:$0 sm:$0xff]  ;;  %v3684_v39 = vand.u32 127, %v341_v37  ;;  %v1849_v53 = vsel %vm1848_vm12, 1, %v3385_v12  ;;  %v2361_v54 = vsel %vm2360_vm13, 1, %v3385_v12 }
  0x17   :  { %3107 = vmatpush3.bf16.msra.mxu0 %v3104_v31  ;;  %2794 = vmatprep.mubr.msk.f32.mxu0 %vm66_vm0, %v48_v17  ;;  %v2540_v16 = vld [vmem:[%s4041_s7] ss:$0 sm:$0xff] }
  0x18   :  { %3109 = vmatprep.subr.bf16.mxu0 %v3108_v41  ;;  %1598 = vperm.xlu0 %3279, %v1596_v45   ;;  %v3678_v27 = vld [vmem:[%s4045_s11] ss:$0 sm:$0xff]  ;;  %vm343_vm6 = vcmp.lt.s32.totalorder %v3684_v39, 16 }
  0x19   :  { %3125 = vmatpush3.bf16.msra.mxu1 %v3569_v42  ;;  %1097 = vperm.xlu1 %3280, %v1095_v51   ;;  %v2581_v39 = vld [vmem:[%s4047_s13] ss:$0 sm:$0xff]  ;;  %s3361_s13 = scalar_lea.vmem %s2524_s25, 384 }
  0x1a   :  { %3126 = vmatprep.subr.bf16.mxu1 %v3386_v38  ;;  %p3362_p0 = scmp.ne.s32.totalorder %s2524_s25, %s3361_s13  ;;  %p3367_p2 = scmp.lt.s32.totalorder %s3361_s13, %s3361_s13 }
  0x1b   :  { %3111 = vmatpush3.bf16.msra.mxu0 %v3108_v41 }
  0x1c   :  { %2806 = vmatmul.mubr.f32.vlgmr.msra.gmra.mrb[2].mxu1 %v3388_v46  ;;  %3113 = vmatprep.subr.bf16.mxu0 %v3112_v49  ;;  %p3368_p3 = por %p3367_p2, %p3366_p1 }
  0x1d   :  { %3128 = vmatpush3.bf16.msra.mxu1 %v3590_v50  ;;  %2816 = vmatprep.mubr.msk.f32.mxu1 %vm3387_vm4, %v3388_v46 }
  0x1e   :  { %3129 = vmatprep.subr.bf16.mxu1 %v3386_v38  ;;  %2107 = vperm.xlu0 %3279, %v2105_v55   ;;  %p3369_p4 = pnand %p3368_p3, %p3362_p0 }
  0x1f   :  { %3115 = vmatpush3.bf16.msra.mxu0 %v3112_v49  ;;  %1353 = vperm.xlu1 %3280, %v1351_v52  }
  0x20   :  { %3117 = vmatprep.subr.bf16.mxu0 %v3116_v56 }
  0x21   :  { %3131 = vmatpush3.bf16.msra.mxu1 %v3608_v57 }
  0x22   :  { %3138 = vmatprep.subr.bf16.mxu1 %v3386_v38 }
  0x23   :  { %3119 = vmatpush3.bf16.msra.mxu0 %v3116_v56  ;;  %1851 = vperm.xlu1 %3280, %v1849_v53  }
  0x24   :  { %2817 = vmatmul.mubr.f32.vlgmr.msra.gmra.mrb[4].mxu1 %v3388_v46  ;;  %3132 = vmatprep.subr.bf16.mxu0 %v3386_v38 }
  0x25   :  { %3140 = vmatpush3.bf16.msra.mxu1 %v3547_v34  ;;  %2838 = vmatprep.mubr.msk.f32.mxu1 %vm3387_vm4, %v3388_v46 }
  0x26   :  { %2795 = vmatmul.mubr.msk.f32.vlgmr.msra.gmra.mrb[2].mxu0 %vm66_vm0, %v3545_v33  ;;  %3141 = vmatprep.subr.bf16.mxu1 %v3386_v38 }
  0x27   :  { %3134 = vmatpush3.bf16.msra.mxu0 %v3621_v60  ;;  %2827 = vmatprep.mubr.msk.f32.mxu0 %vm3387_vm4, %v3388_v46 }
  0x28   :  { %3135 = vmatprep.subr.bf16.mxu0 %v3386_v38  ;;  %2363 = vperm.xlu1 %3280, %v2361_v54  }
  0x29   :  { %3143 = vmatpush3.bf16.msra.mxu1 %v3569_v42 }
  0x2a   :  { %3150 = vmatprep.subr.bf16.mxu1 %v3386_v38 }
  0x2b   :  { %3137 = vmatpush3.bf16.msra.mxu0 %v3638_v63 }
  0x2c   :  { %3144 = vmatprep.subr.bf16.mxu0 %v3386_v38 }
  0x2e   :  { %2828 = vmatmul.mubr.f32.vlgmr.msra.gmra.mrb[4].mxu0 %v3388_v46 }
  0x2f   :  { %3146 = vmatpush3.bf16.msra.mxu0 %v3590_v50  ;;  %2849 = vmatprep.mubr.msk.f32.mxu0 %vm3387_vm4, %v3388_v46 }
  0x30   :  { %3147 = vmatprep.subr.bf16.mxu0 %v3386_v38 }
  0x33   :  { %3149 = vmatpush3.bf16.msra.mxu0 %v3608_v57 }
  0x34   :  { %3156 = vmatprep.subr.bf16.mxu0 %v3386_v38 }
  0x8f   :  { %v3686_v41 = vpop.permute.xlu0 %588 }
  0x90   :  { %vm590_vm7 = vcmp.eq.s32.totalorder %v3686_v41, 1 }
  0x91   :  { %vm591_vm8 = vmor %vm343_vm6, %vm590_vm7 }
  0xe7   :  { %v2777_v2 = vpop.f32.mrb[0].mxu1 }
  0xe8   :  { %v3660_v3 = vadd.f32 %v2777_v2, %v2537_v0  ;;  %v229_v4 = vpop.f32.mrb[1].mxu1  ;;  %v2758_v5 = vpop.f32.mrb[0].mxu0 }
  0xe9   :  { %v3662_v6 = vadd.f32 %v2758_v5, %v2534_v1  ;;  %v139_v7 = vpop.f32.mrb[1].mxu0  ;;  %v3667_v14 = vadd.f32 %v2537_v0, %v229_v4 }
  0xea   :  { %v3664_v8 = vadd.f32 %v2534_v1, %v139_v7 }
  0xef   :  { %v414_v9 = vpop.f32.mrb[2].mxu1 }
  0xf0   :  { %v488_v10 = vadd.f32 %v414_v9, %v3664_v8  ;;  %v2807_v11 = vpop.f32.mrb[3].mxu1 }
  0xf2   :  { %v2543_v13 = vmul.f32 -1.442695, %v488_v10 }
  0xf4   :  { %3281 = vpow2.f32 %v2543_v13 }
  0xf7   :  { %v484_v15 = vpop.f32.mrb[4].mxu1 }
  0xf8   :  { %v495_v17 = vadd.f32 %v484_v15, %v3667_v14  ;;  %v2818_v18 = vpop.f32.mrb[5].mxu1 }
  0xf9   :  { %v2796_v19 = vpop.f32.mrb[2].mxu0 }
  0xfa   :  { %v2544_v20 = vmul.f32 -1.442695, %v495_v17  ;;  %v3673_v21 = vadd.f32 %v2796_v19, %v2540_v16  ;;  %v319_v22 = vpop.f32.mrb[3].mxu0 }
  0xfb   :  { %v3681_v33 = vadd.f32 %v2540_v16, %v319_v22 }
  0xfc   :  { %3283 = vpow2.f32 %v2544_v20 }
  0xfe   :  { %v3282_v23 = vpop.eup %3281 }
  0xff   :  { %v492_v24 = vadd.f32 1.0, %v3282_v23 }
 0x101   :  { %3285 = vrcp.f32 %v492_v24  ;;  %v574_v25 = vpop.f32.mrb[4].mxu0 }
 0x102   :  { %v2829_v26 = vpop.f32.mrb[5].mxu0  ;;  %v575_v31 = vadd.f32 %v3678_v27, %v574_v25  ;;  %v3733_v25 = vpop.permute.xlu0 %841 }
 0x103   :  { %vm843_vm14 = vcmp.eq.s32.totalorder %v3733_v25, 1 }
 0x104   :  { %vm844_vm15 = vmor %vm343_vm6, %vm843_vm14 }
 0x106   :  { %v3284_v29 = vpop.eup %3283 }
 0x107   :  { %v499_v30 = vadd.f32 1.0, %v3284_v29 }
 0x109   :  { %3287 = vrcp.f32 %v499_v30 }
 0x10b   :  { %v3286_v32 = vpop.eup %3285 }
 0x10c   :  { %v578_v35 = vmul.f32 %v3286_v32, %v575_v31 }
 0x10e   :  { %v579_v36 = vadd.f32 %v578_v35, %v3681_v33 }
 0x110   :  { %3289 = vtanh.f32 %v579_v36 }
 0x113   :  { %v3288_v40 = vpop.eup %3287 }
 0x114   :  { %v581_v43 = vsub.f32 1.0, %v3288_v40  ;;  %v583_v47 = vmul.f32 0.0, %v3288_v40 }
 0x11a   :  { %v3290_v44 = vpop.eup %3289 }
 0x11b   :  { %v582_v45 = vmul.f32 %v3290_v44, %v581_v43 }
 0x11d   :  { %v584_v48 = vadd.f32 %v583_v47, %v582_v45 }
 0x11f   :  { %v3694_v49 = vsel %vm591_vm8, %v584_v48, 0.0 }
 0x120   :  { %2839 = vmatmul.mubr.msk.f32.vlgmr.msra.gmra.mrb[6].mxu1 %vm344_vm9, %v3694_v49  ;;  %2850 = vmatmul.mubr.msk.f32.vlgmr.msra.gmra.mrb[6].mxu0 %vm344_vm9, %v3694_v49  ;;  %v834_v19 = vrot.slane %v3694_v49, 6 }
 0x121   :  { %3152 = vmatpush3.bf16.msra.mxu1 %v3621_v60  ;;  %2860 = vmatprep.mubr.msk.f32.mxu1 %vm3387_vm4, %v3388_v46 }
 0x122   :  { %3153 = vmatprep.subr.bf16.mxu1 %v3386_v38  ;;  %3158 = vmatpush3.bf16.msra.mxu0 %v3547_v34 }
 0x123   :  { %3159 = vmatprep.subr.bf16.mxu0 %v3386_v38  ;;  %2871 = vmatprep.mubr.msk.f32.mxu0 %vm3387_vm4, %v3388_v46 }
 0x125   :  { %3155 = vmatpush3.bf16.msra.mxu1 %v3638_v63 }
 0x126   :  { %3162 = vmatprep.subr.bf16.mxu1 %v3386_v38  ;;  %3161 = vmatpush3.bf16.msra.mxu0 %v3569_v42 }
 0x127   :  { %3168 = vmatprep.subr.bf16.mxu0 %v3386_v38 }
 0x128   :  { %2861 = vmatmul.mubr.msk.f32.vlgmr.msra.gmra.mrb[8].mxu1 %vm344_vm9, %v3694_v49 }
 0x129   :  { %3164 = vmatpush3.bf16.msra.mxu1 %v3590_v50  ;;  %2882 = vmatprep.mubr.msk.f32.mxu1 %vm3387_vm4, %v3388_v46 }
 0x12a   :  { %3165 = vmatprep.subr.bf16.mxu1 %v3386_v38 }
 0x12d   :  { %3167 = vmatpush3.bf16.msra.mxu1 %v3608_v57 }
 0x12e   :  { %3174 = vmatprep.subr.bf16.mxu1 %v3386_v38 }
 0x1f3   :  { %v662_v55 = vpop.f32.mrb[6].mxu1  ;;  %v732_v56 = vpop.f32.mrb[6].mxu0 }
 0x1f4   :  { %v737_v58 = vrot.slane %v662_v55, 6  ;;  %v2840_v59 = vpop.f32.mrb[7].mxu1  ;;  %v2851_v61 = vpop.f32.mrb[7].mxu0  ;;  %v747_v62 = vrot.slane %v732_v56, 6 }
 0x1f6   :  { %v739_v0 = vadd.f32 %v737_v58, %v3664_v8  ;;  %v749_v2 = vadd.f32 %v747_v62, %v3667_v14 }
 0x1f8   :  { %v2548_v1 = vmul.f32 -1.442695, %v739_v0  ;;  %v2549_v7 = vmul.f32 -1.442695, %v749_v2 }
 0x1fa   :  { %3291 = vpow2.f32 %v2548_v1 }
 0x1fb   :  { %v822_v4 = vpop.f32.mrb[8].mxu1  ;;  %3293 = vpow2.f32 %v2549_v7 }
 0x1fc   :  { %v2862_v5 = vpop.f32.mrb[9].mxu1  ;;  %v823_v10 = vadd.f32 %v3678_v27, %v822_v4 }
 0x1fd   :  { %v3772_v5 = vpop.permute.xlu1 %1097 }
 0x1fe   :  { %v827_v13 = vrot.slane %v823_v10, 6  ;;  %vm1099_vm0 = vcmp.eq.s32.totalorder %v3772_v5, 1 }
 0x1ff   :  { %vm1100_vm1 = vmor %vm343_vm6, %vm1099_vm0 }
 0x204   :  { %v3292_v28 = vpop.eup %3291 }
 0x205   :  { %v743_v9 = vadd.f32 1.0, %v3292_v28  ;;  %v3294_v12 = vpop.eup %3293 }
 0x206   :  { %v753_v11 = vadd.f32 1.0, %v3294_v12 }
 0x207   :  { %3295 = vrcp.f32 %v743_v9 }
 0x208   :  { %3297 = vrcp.f32 %v753_v11 }
 0x211   :  { %v3296_v15 = vpop.eup %3295 }
 0x212   :  { %v829_v16 = vmul.f32 %v3296_v15, %v827_v13  ;;  %v3298_v18 = vpop.eup %3297 }
 0x213   :  { %v832_v20 = vsub.f32 1.0, %v3298_v18  ;;  %v836_v23 = vmul.f32 %v3298_v18, %v834_v19 }
 0x214   :  { %v830_v17 = vadd.f32 %v829_v16, %v3681_v33 }
 0x216   :  { %3299 = vtanh.f32 %v830_v17 }
 0x220   :  { %v3300_v22 = vpop.eup %3299 }
 0x221   :  { %v833_v24 = vmul.f32 %v3300_v22, %v832_v20 }
 0x223   :  { %v837_v26 = vadd.f32 %v836_v23, %v833_v24 }
 0x225   :  { %v846_v29 = vrot.slane %v837_v26, 2 }
 0x227   :  { %v3741_v30 = vsel %vm844_vm15, %v846_v29, %v3694_v49 }
 0x228   :  { %2872 = vmatmul.mubr.msk.f32.vlgmr.msra.gmra.mrb[8].mxu0 %vm344_vm9, %v3741_v30  ;;  %2883 = vmatmul.mubr.msk.f32.vlgmr.msra.gmra.mrb[10].mxu1 %vm344_vm9, %v3741_v30  ;;  %v1090_v2 = vrot.slane %v3741_v30, 4 }
 0x229   :  { %3170 = vmatpush3.bf16.msra.mxu0 %v3621_v60  ;;  %2893 = vmatprep.mubr.msk.f32.mxu0 %vm3387_vm4, %v3388_v46 }
 0x22a   :  { %3171 = vmatprep.subr.bf16.mxu0 %v3386_v38  ;;  %3176 = vmatpush3.bf16.msra.mxu1 %v3547_v34 }
 0x22b   :  { %3177 = vmatprep.subr.bf16.mxu1 %v3386_v38  ;;  %2904 = vmatprep.mubr.msk.f32.mxu1 %vm3387_vm4, %v3388_v46 }
 0x22d   :  { %3173 = vmatpush3.bf16.msra.mxu0 %v3638_v63 }
 0x22e   :  { %3180 = vmatprep.subr.bf16.mxu0 %v3386_v38  ;;  %3179 = vmatpush3.bf16.msra.mxu1 %v3569_v42 }
 0x22f   :  { %3186 = vmatprep.subr.bf16.mxu1 %v3386_v38 }
 0x230   :  { %2894 = vmatmul.mubr.msk.f32.vlgmr.msra.gmra.mrb[10].mxu0 %vm344_vm9, %v3741_v30 }
 0x231   :  { %3182 = vmatpush3.bf16.msra.mxu0 %v3590_v50  ;;  %2915 = vmatprep.mubr.msk.f32.mxu0 %vm3387_vm4, %v3388_v46 }
 0x232   :  { %3183 = vmatprep.subr.bf16.mxu0 %v3386_v38 }
 0x235   :  { %3185 = vmatpush3.bf16.msra.mxu0 %v3608_v57 }
 0x236   :  { %3192 = vmatprep.subr.bf16.mxu0 %v3386_v38 }
 0x2fb   :  { %v918_v31 = vpop.f32.mrb[8].mxu0  ;;  %v988_v32 = vpop.f32.mrb[10].mxu1 }
 0x2fc   :  { %v993_v35 = vrot.slane %v918_v31, 4  ;;  %v2873_v36 = vpop.f32.mrb[9].mxu0  ;;  %v2884_v37 = vpop.f32.mrb[11].mxu1  ;;  %v1003_v40 = vrot.slane %v988_v32, 4 }
 0x2fe   :  { %v995_v43 = vadd.f32 %v993_v35, %v3664_v8  ;;  %v1005_v45 = vadd.f32 %v1003_v40, %v3667_v14 }
 0x300   :  { %v2553_v44 = vmul.f32 -1.442695, %v995_v43  ;;  %v2554_v51 = vmul.f32 -1.442695, %v1005_v45 }
 0x302   :  { %3301 = vpow2.f32 %v2553_v44 }
 0x303   :  { %v1078_v47 = vpop.f32.mrb[10].mxu0  ;;  %3303 = vpow2.f32 %v2554_v51 }
 0x304   :  { %v2895_v48 = vpop.f32.mrb[11].mxu0  ;;  %v1079_v55 = vadd.f32 %v3678_v27, %v1078_v47 }
 0x306   :  { %v1083_v58 = vrot.slane %v1079_v55, 4 }
 0x30c   :  { %v3302_v52 = vpop.eup %3301 }
 0x30d   :  { %v999_v53 = vadd.f32 1.0, %v3302_v52  ;;  %v3304_v54 = vpop.eup %3303  ;;  %v3811_v52 = vpop.permute.xlu1 %1353 }
 0x30e   :  { %v1009_v56 = vadd.f32 1.0, %v3304_v54  ;;  %vm1355_vm2 = vcmp.eq.s32.totalorder %v3811_v52, 1 }
 0x30f   :  { %3305 = vrcp.f32 %v999_v53  ;;  %vm1356_vm3 = vmor %vm343_vm6, %vm1355_vm2 }
 0x310   :  { %3307 = vrcp.f32 %v1009_v56 }
 0x319   :  { %v3306_v59 = vpop.eup %3305 }
 0x31a   :  { %v1085_v61 = vmul.f32 %v3306_v59, %v1083_v58  ;;  %v3308_v0 = vpop.eup %3307 }
 0x31b   :  { %v1088_v1 = vsub.f32 1.0, %v3308_v0  ;;  %v1092_v28 = vmul.f32 %v3308_v0, %v1090_v2 }
 0x31c   :  { %v1086_v62 = vadd.f32 %v1085_v61, %v3681_v33 }
 0x31e   :  { %3309 = vtanh.f32 %v1086_v62 }
 0x328   :  { %v3310_v4 = vpop.eup %3309 }
 0x329   :  { %v1089_v7 = vmul.f32 %v3310_v4, %v1088_v1 }
 0x32b   :  { %v1093_v9 = vadd.f32 %v1092_v28, %v1089_v7 }
 0x32d   :  { %v1102_v12 = vrot.slane %v1093_v9, 4 }
 0x32f   :  { %v3780_v10 = vsel %vm1100_vm1, %v1102_v12, %v3741_v30  ;;  %vm2409_vm1 = vcmask 1045504  }
 0x330   :  { %2905 = vmatmul.mubr.msk.f32.vlgmr.msra.gmra.mrb[12].mxu1 %vm344_vm9, %v3780_v10  ;;  %2916 = vmatmul.mubr.msk.f32.vlgmr.msra.gmra.mrb[12].mxu0 %vm344_vm9, %v3780_v10  ;;  %v1346_v44 = vrot.slane %v3780_v10, 2 }
 0x331   :  { %3188 = vmatpush3.bf16.msra.mxu1 %v3621_v60  ;;  %2926 = vmatprep.mubr.msk.f32.mxu1 %vm3387_vm4, %v3388_v46 }
 0x332   :  { %3189 = vmatprep.subr.bf16.mxu1 %v3386_v38  ;;  %3194 = vmatpush3.bf16.msra.mxu0 %v3547_v34 }
 0x333   :  { %3195 = vmatprep.subr.bf16.mxu0 %v3386_v38  ;;  %2937 = vmatprep.mubr.msk.f32.mxu0 %vm3387_vm4, %v3388_v46 }
 0x335   :  { %3191 = vmatpush3.bf16.msra.mxu1 %v3638_v63 }
 0x336   :  { %3198 = vmatprep.subr.bf16.mxu1 %v3386_v38  ;;  %3197 = vmatpush3.bf16.msra.mxu0 %v3569_v42 }
 0x337   :  { %3204 = vmatprep.subr.bf16.mxu0 %v3386_v38 }
 0x338   :  { %2927 = vmatmul.mubr.msk.f32.vlgmr.msra.gmra.mrb[14].mxu1 %vm344_vm9, %v3780_v10 }
 0x339   :  { %3200 = vmatpush3.bf16.msra.mxu1 %v3590_v50  ;;  %2948 = vmatprep.mubr.msk.f32.mxu1 %vm3387_vm4, %v3388_v46 }
 0x33a   :  { %3201 = vmatprep.subr.bf16.mxu1 %v3386_v38 }
 0x33d   :  { %3203 = vmatpush3.bf16.msra.mxu1 %v3608_v57 }
 0x33e   :  { %3210 = vmatprep.subr.bf16.mxu1 %v3386_v38 }
 0x403   :  { %v1174_v11 = vpop.f32.mrb[12].mxu1  ;;  %v1244_v13 = vpop.f32.mrb[12].mxu0 }
 0x404   :  { %v1249_v15 = vrot.slane %v1174_v11, 2  ;;  %v2906_v16 = vpop.f32.mrb[13].mxu1  ;;  %v2917_v17 = vpop.f32.mrb[13].mxu0  ;;  %v1259_v18 = vrot.slane %v1244_v13, 2 }
 0x406   :  { %v1251_v19 = vadd.f32 %v1249_v15, %v3664_v8  ;;  %v1261_v22 = vadd.f32 %v1259_v18, %v3667_v14 }
 0x408   :  { %v2558_v20 = vmul.f32 -1.442695, %v1251_v19  ;;  %v2559_v26 = vmul.f32 -1.442695, %v1261_v22 }
 0x40a   :  { %3311 = vpow2.f32 %v2558_v20  ;;  %v3849_v20 = vpop.permute.xlu0 %1598 }
 0x40b   :  { %v1334_v23 = vpop.f32.mrb[14].mxu1  ;;  %3313 = vpow2.f32 %v2559_v26  ;;  %vm1600_vm5 = vcmp.eq.s32.totalorder %v3849_v20, 1 }
 0x40c   :  { %v2928_v24 = vpop.f32.mrb[15].mxu1  ;;  %v1335_v35 = vadd.f32 %v3678_v27, %v1334_v23  ;;  %vm1601_vm8 = vmor %vm343_vm6, %vm1600_vm5 }
 0x40e   :  { %v1339_v37 = vrot.slane %v1335_v35, 2 }
 0x414   :  { %v3312_v29 = vpop.eup %3311 }
 0x415   :  { %v1255_v31 = vadd.f32 1.0, %v3312_v29  ;;  %v3314_v32 = vpop.eup %3313 }
 0x416   :  { %v1265_v36 = vadd.f32 1.0, %v3314_v32 }
 0x417   :  { %3315 = vrcp.f32 %v1255_v31 }
 0x418   :  { %3317 = vrcp.f32 %v1265_v36 }
 0x421   :  { %v3316_v40 = vpop.eup %3315 }
 0x422   :  { %v1341_v43 = vmul.f32 %v3316_v40, %v1339_v37  ;;  %v3318_v14 = vpop.eup %3317 }
 0x423   :  { %v1344_v45 = vsub.f32 1.0, %v3318_v14  ;;  %v1348_v48 = vmul.f32 %v3318_v14, %v1346_v44 }
 0x424   :  { %v1342_v8 = vadd.f32 %v1341_v43, %v3681_v33 }
 0x426   :  { %3319 = vtanh.f32 %v1342_v8 }
 0x430   :  { %v3320_v47 = vpop.eup %3319 }
 0x431   :  { %v1345_v51 = vmul.f32 %v3320_v47, %v1344_v45 }
 0x433   :  { %v1349_v53 = vadd.f32 %v1348_v48, %v1345_v51 }
 0x435   :  { %v1358_v54 = vrot.slane %v1349_v53, 6 }
 0x437   :  { %v3819_v33 = vsel %vm1356_vm3, %v1358_v54, %v3780_v10 }
 0x438   :  { %2938 = vmatmul.mubr.msk.f32.vlgmr.msra.gmra.mrb[14].mxu0 %vm344_vm9, %v3819_v33  ;;  %2949 = vmatmul.mubr.msk.f32.vlgmr.msra.gmra.mrb[16].mxu1 %vm344_vm9, %v3819_v33 }
 0x439   :  { %3206 = vmatpush3.bf16.msra.mxu0 %v3621_v60  ;;  %2959 = vmatprep.mubr.msk.f32.mxu0 %vm3387_vm4, %v3388_v46 }
 0x43a   :  { %3207 = vmatprep.subr.bf16.mxu0 %v3386_v38  ;;  %3212 = vmatpush3.bf16.msra.mxu1 %v3547_v34 }
 0x43b   :  { %3213 = vmatprep.subr.bf16.mxu1 %v3386_v38  ;;  %2970 = vmatprep.mubr.msk.f32.mxu1 %vm3387_vm4, %v3388_v46 }
 0x43d   :  { %3209 = vmatpush3.bf16.msra.mxu0 %v3638_v63 }
 0x43e   :  { %3216 = vmatprep.subr.bf16.mxu0 %v3386_v38  ;;  %3215 = vmatpush3.bf16.msra.mxu1 %v3569_v42 }
 0x43f   :  { %3222 = vmatprep.subr.bf16.mxu1 %v3386_v38 }
 0x440   :  { %2960 = vmatmul.mubr.msk.f32.vlgmr.msra.gmra.mrb[16].mxu0 %vm344_vm9, %v3819_v33 }
 0x441   :  { %3218 = vmatpush3.bf16.msra.mxu0 %v3590_v50  ;;  %2981 = vmatprep.mubr.msk.f32.mxu0 %vm3387_vm4, %v3388_v46 }
 0x442   :  { %3219 = vmatprep.subr.bf16.mxu0 %v3386_v38 }
 0x445   :  { %3221 = vmatpush3.bf16.msra.mxu0 %v3608_v57 }
 0x446   :  { %3228 = vmatprep.subr.bf16.mxu0 %v3386_v38 }
 0x50b   :  { %v1430_v55 = vpop.f32.mrb[14].mxu0  ;;  %v1500_v56 = vpop.f32.mrb[16].mxu1 }
 0x50c   :  { %v1504_v58 = vadd.f32 %v1430_v55, %v3662_v6  ;;  %v2939_v59 = vpop.f32.mrb[15].mxu0  ;;  %v2950_v61 = vpop.f32.mrb[17].mxu1  ;;  %v1511_v0 = vadd.f32 %v1500_v56, %v3660_v3 }
 0x50e   :  { %v2563_v62 = vmul.f32 -1.442695, %v1504_v58  ;;  %v2564_v1 = vmul.f32 -1.442695, %v1511_v0 }
 0x510   :  { %3321 = vpow2.f32 %v2563_v62 }
 0x511   :  { %3323 = vpow2.f32 %v2564_v1 }
 0x513   :  { %v1584_v2 = vpop.f32.mrb[16].mxu0 }
 0x514   :  { %v2961_v4 = vpop.f32.mrb[17].mxu0  ;;  %v1585_v11 = vadd.f32 %v3678_v27, %v1584_v2 }
 0x51a   :  { %v3322_v7 = vpop.eup %3321 }
 0x51b   :  { %v1508_v28 = vadd.f32 1.0, %v3322_v7  ;;  %v3324_v9 = vpop.eup %3323  ;;  %v3889_v7 = vpop.permute.xlu1 %1851 }
 0x51c   :  { %v1515_v12 = vadd.f32 1.0, %v3324_v9  ;;  %vm1853_vm10 = vcmp.eq.s32.totalorder %v3889_v7, 1 }
 0x51d   :  { %3325 = vrcp.f32 %v1508_v28  ;;  %vm1854_vm11 = vmor %vm343_vm6, %vm1853_vm10 }
 0x51e   :  { %3327 = vrcp.f32 %v1515_v12 }
 0x527   :  { %v3326_v13 = vpop.eup %3325 }
 0x528   :  { %v1588_v15 = vmul.f32 %v3326_v13, %v1585_v11  ;;  %v3328_v17 = vpop.eup %3327 }
 0x529   :  { %v1591_v18 = vsub.f32 1.0, %v3328_v17  ;;  %v1593_v22 = vmul.f32 %v3328_v17, %v3819_v33 }
 0x52a   :  { %v1589_v16 = vadd.f32 %v1588_v15, %v3673_v21 }
 0x52c   :  { %3329 = vtanh.f32 %v1589_v16 }
 0x536   :  { %v3330_v19 = vpop.eup %3329 }
 0x537   :  { %v1592_v23 = vmul.f32 %v3330_v19, %v1591_v18 }
 0x539   :  { %v1594_v24 = vadd.f32 %v1593_v22, %v1592_v23 }
 0x53b   :  { %v3858_v26 = vsel %vm1601_vm8, %v1594_v24, %v3819_v33 }
 0x53c   :  { %2971 = vmatmul.mubr.msk.f32.vlgmr.msra.gmra.mrb[18].mxu1 %vm344_vm9, %v3858_v26  ;;  %2982 = vmatmul.mubr.msk.f32.vlgmr.msra.gmra.mrb[18].mxu0 %vm344_vm9, %v3858_v26  ;;  %v1844_v0 = vrot.slane %v3858_v26, 6 }
 0x53d   :  { %3224 = vmatpush3.bf16.msra.mxu1 %v3621_v60  ;;  %2992 = vmatprep.mubr.msk.f32.mxu1 %vm3387_vm4, %v3388_v46 }
 0x53e   :  { %3225 = vmatprep.subr.bf16.mxu1 %v3386_v38  ;;  %3230 = vmatpush3.bf16.msra.mxu0 %v3547_v34 }
 0x53f   :  { %3231 = vmatprep.subr.bf16.mxu0 %v3386_v38  ;;  %3003 = vmatprep.mubr.msk.f32.mxu0 %vm3387_vm4, %v3388_v46 }
 0x541   :  { %3227 = vmatpush3.bf16.msra.mxu1 %v3638_v63 }
 0x542   :  { %3234 = vmatprep.subr.bf16.mxu1 %v3386_v38  ;;  %3233 = vmatpush3.bf16.msra.mxu0 %v3569_v42 }
 0x543   :  { %3240 = vmatprep.subr.bf16.mxu0 %v3386_v38 }
 0x544   :  { %2993 = vmatmul.mubr.msk.f32.vlgmr.msra.gmra.mrb[20].mxu1 %vm344_vm9, %v3858_v26 }
 0x545   :  { %3236 = vmatpush3.bf16.msra.mxu1 %v3590_v50  ;;  %3014 = vmatprep.mubr.msk.f32.mxu1 %vm3387_vm4, %v3388_v46 }
 0x546   :  { %3237 = vmatprep.subr.bf16.mxu1 %v3386_v38 }
 0x549   :  { %3239 = vmatpush3.bf16.msra.mxu1 %v3608_v57 }
 0x54a   :  { %3246 = vmatprep.subr.bf16.mxu1 %v3386_v38 }
 0x60f   :  { %v1672_v29 = vpop.f32.mrb[18].mxu1  ;;  %v1742_v31 = vpop.f32.mrb[18].mxu0 }
 0x610   :  { %v1747_v32 = vrot.slane %v1672_v29, 6  ;;  %v2972_v35 = vpop.f32.mrb[19].mxu1  ;;  %v2983_v36 = vpop.f32.mrb[19].mxu0  ;;  %v1757_v37 = vrot.slane %v1742_v31, 6 }
 0x612   :  { %v1749_v40 = vadd.f32 %v1747_v32, %v3662_v6  ;;  %v1759_v8 = vadd.f32 %v1757_v37, %v3660_v3 }
 0x614   :  { %v2568_v43 = vmul.f32 -1.442695, %v1749_v40  ;;  %v2569_v45 = vmul.f32 -1.442695, %v1759_v8 }
 0x616   :  { %3331 = vpow2.f32 %v2568_v43 }
 0x617   :  { %v1832_v14 = vpop.f32.mrb[20].mxu1  ;;  %3333 = vpow2.f32 %v2569_v45  ;;  %v3927_v45 = vpop.permute.xlu0 %2107 }
 0x618   :  { %v2994_v44 = vpop.f32.mrb[21].mxu1  ;;  %v1833_v53 = vadd.f32 %v3678_v27, %v1832_v14  ;;  %vm2109_vm12 = vcmp.eq.s32.totalorder %v3927_v45, 1 }
 0x619   :  { %vm2110_vm13 = vmor %vm343_vm6, %vm2109_vm12 }
 0x61a   :  { %v1837_v55 = vrot.slane %v1833_v53, 6 }
 0x620   :  { %v3332_v47 = vpop.eup %3331 }
 0x621   :  { %v1753_v48 = vadd.f32 1.0, %v3332_v47  ;;  %v3334_v51 = vpop.eup %3333 }
 0x622   :  { %v1763_v54 = vadd.f32 1.0, %v3334_v51 }
 0x623   :  { %3335 = vrcp.f32 %v1753_v48 }
 0x624   :  { %3337 = vrcp.f32 %v1763_v54 }
 0x62d   :  { %v3336_v56 = vpop.eup %3335 }
 0x62e   :  { %v1839_v58 = vmul.f32 %v3336_v56, %v1837_v55  ;;  %v3338_v61 = vpop.eup %3337  ;;  %v2414_v55 = vld [vmem:[%s4046_s12] sm:$0xff]  ;;  %v2415_v56 = vld [vmem:[%s4046_s12 + $0x8] sm:$0xff] }
 0x62f   :  { %v1842_v62 = vsub.f32 1.0, %v3338_v61  ;;  %v1846_v2 = vmul.f32 %v3338_v61, %v1844_v0 }
 0x630   :  { %v1840_v59 = vadd.f32 %v1839_v58, %v3673_v21 }
 0x632   :  { %3339 = vtanh.f32 %v1840_v59 }
 0x63c   :  { %v3340_v1 = vpop.eup %3339 }
 0x63d   :  { %v1843_v4 = vmul.f32 %v3340_v1, %v1842_v62 }
 0x63f   :  { %v1847_v28 = vadd.f32 %v1846_v2, %v1843_v4 }
 0x641   :  { %v1856_v9 = vrot.slane %v1847_v28, 2 }
 0x643   :  { %v3897_v12 = vsel %vm1854_vm11, %v1856_v9, %v3858_v26 }
 0x644   :  { %3004 = vmatmul.mubr.msk.f32.vlgmr.msra.gmra.mrb[20].mxu0 %vm344_vm9, %v3897_v12  ;;  %3015 = vmatmul.mubr.msk.f32.vlgmr.msra.gmra.mrb[22].mxu1 %vm344_vm9, %v3897_v12  ;;  %v2100_v14 = vrot.slane %v3897_v12, 4 }
 0x645   :  { %3242 = vmatpush3.bf16.msra.mxu0 %v3621_v60  ;;  %3025 = vmatprep.mubr.msk.f32.mxu0 %vm3387_vm4, %v3388_v46 }
 0x646   :  { %3243 = vmatprep.subr.bf16.mxu0 %v3386_v38  ;;  %3248 = vmatpush3.bf16.msra.mxu1 %v3547_v34 }
 0x647   :  { %3249 = vmatprep.subr.bf16.mxu1 %v3386_v38  ;;  %3036 = vmatprep.mubr.msk.f32.mxu1 %vm3387_vm4, %v3388_v46 }
 0x649   :  { %3245 = vmatpush3.bf16.msra.mxu0 %v3638_v63 }
 0x64a   :  { %3252 = vmatprep.subr.bf16.mxu0 %v3386_v38  ;;  %3251 = vmatpush3.bf16.msra.mxu1 %v3569_v42 }
 0x64b   :  { %3258 = vmatprep.subr.bf16.mxu1 %v3386_v38 }
 0x64c   :  { %3026 = vmatmul.mubr.msk.f32.vlgmr.msra.gmra.mrb[22].mxu0 %vm344_vm9, %v3897_v12 }
 0x64d   :  { %3254 = vmatpush3.bf16.msra.mxu0 %v3590_v50  ;;  %3047 = vmatprep.mubr.msk.f32.mxu0 %vm3387_vm4, %v3388_v46 }
 0x64e   :  { %3255 = vmatprep.subr.bf16.mxu0 %v3386_v38 }
 0x651   :  { %3257 = vmatpush3.bf16.msra.mxu0 %v3608_v57 }
 0x717   :  { %v1928_v34 = vpop.f32.mrb[20].mxu0  ;;  %v1998_v11 = vpop.f32.mrb[22].mxu1 }
 0x718   :  { %v2003_v13 = vrot.slane %v1928_v34, 4  ;;  %v3005_v15 = vpop.f32.mrb[21].mxu0  ;;  %v3016_v16 = vpop.f32.mrb[23].mxu1  ;;  %v2013_v42 = vrot.slane %v1998_v11, 4 }
 0x71a   :  { %v2005_v17 = vadd.f32 %v2003_v13, %v3662_v6  ;;  %v2015_v19 = vadd.f32 %v2013_v42, %v3660_v3 }
 0x71c   :  { %v2573_v18 = vmul.f32 -1.442695, %v2005_v17  ;;  %v2574_v23 = vmul.f32 -1.442695, %v2015_v19 }
 0x71e   :  { %3341 = vpow2.f32 %v2573_v18 }
 0x71f   :  { %v2088_v50 = vpop.f32.mrb[22].mxu0  ;;  %3343 = vpow2.f32 %v2574_v23 }
 0x720   :  { %v3027_v22 = vpop.f32.mrb[23].mxu0  ;;  %v2089_v31 = vadd.f32 %v3678_v27, %v2088_v50 }
 0x721   :  { %v2364_v22 = vpop.permute.xlu1 %2363 }
 0x722   :  { %v2093_v35 = vrot.slane %v2089_v31, 4 }
 0x728   :  { %v3342_v24 = vpop.eup %3341 }
 0x729   :  { %v2009_v29 = vadd.f32 1.0, %v3342_v24  ;;  %v3344_v57 = vpop.eup %3343 }
 0x72a   :  { %v2019_v32 = vadd.f32 1.0, %v3344_v57  ;;  %v2381_v57 = vsel %vm343_vm6, %v3897_v12, %v3780_v10 }
 0x72b   :  { %3345 = vrcp.f32 %v2009_v29 }
 0x72c   :  { %3347 = vrcp.f32 %v2019_v32 }
 0x735   :  { %v3346_v36 = vpop.eup %3345 }
 0x736   :  { %v2095_v37 = vmul.f32 %v3346_v36, %v2093_v35  ;;  %v3348_v43 = vpop.eup %3347  ;;  %v2375_v36 = vsel %vm343_vm6, %v3780_v10, %v3897_v12 }
 0x737   :  { %v2098_v8 = vsub.f32 1.0, %v3348_v43  ;;  %v2102_v47 = vmul.f32 %v3348_v43, %v2100_v14  ;;  %v2379_v43 = vsel %vm343_vm6, %v3858_v26, %v3819_v33  ;;  %v2376_v5 = vsel %vm1853_vm10, %v2375_v36, 0.0 }
 0x738   :  { %v2096_v40 = vadd.f32 %v2095_v37, %v3673_v21  ;;  %v2377_v37 = vsel %vm343_vm6, %v3819_v33, %v3858_v26  ;;  %v2380_v25 = vsel %vm1355_vm2, %v2379_v43, 0.0 }
 0x73a   :  { %3349 = vtanh.f32 %v2096_v40  ;;  %v2382_v40 = vsel %vm1099_vm0, %v2381_v57, 0.0  ;;  %vm2405_vm0 = vcmask 1041408  }
 0x73b   :  { %v2397_v14 = vrot.slane %v2382_v40, 6 }
 0x744   :  { %v3350_v44 = vpop.eup %3349 }
 0x745   :  { %v2099_v48 = vmul.f32 %v3350_v44, %v2098_v8 }
 0x747   :  { %v2103_v51 = vadd.f32 %v2102_v47, %v2099_v48  ;;  %v2391_v47 = vrot.slane %v2376_v5, 4 }
 0x749   :  { %v2112_v53 = vrot.slane %v2103_v51, 4 }
 0x74b   :  { %v3935_v54 = vsel %vm2110_vm13, %v2112_v53, %v3897_v12  ;;  %v2378_v12 = vsel %vm1600_vm5, %v2377_v37, 0.0 }
 0x74c   :  { %3037 = vmatmul.mubr.msk.f32.vlgmr.msra.gmra.mrb[24].mxu1 %vm344_vm9, %v3935_v54  ;;  %3048 = vmatmul.mubr.msk.f32.vlgmr.msra.gmra.mrb[24].mxu0 %vm344_vm9, %v3935_v54  ;;  %v2356_v24 = vrot.slane %v3935_v54, 2  ;;  %v2383_v32 = vsel %vm343_vm6, %v3935_v54, %v3741_v30  ;;  %v2394_v52 = vrot.slane %v2378_v12, 2 }
 0x74d   :  { %3260 = vmatpush3.bf16.msra.mxu1 %v3621_v60  ;;  %3058 = vmatprep.mubr.msk.f32.mxu1 %vm3387_vm4, %v3388_v46  ;;  %v2416_v60 = vld [vmem:[%s4046_s12 + $0x10] sm:$0xff]  ;;  %v3264_v46 = vpack.c.bf16 %v2415_v56, %v2414_v55  ;;  %vm2365_vm4 = vcmp.eq.s32.totalorder %v2364_v22, 1 }
 0x74e   :  { %3261 = vmatprep.subr.bf16.mxu1 %v3386_v38  ;;  %v2417_v38 = vld [vmem:[%s4046_s12 + $0x18] sm:$0xff]  ;;  %vm2366_vm15 = vmor %vm343_vm6, %vm2365_vm4 }
 0x74f   :  { %3265 = vmatprep.subr.bf16.mxu0 %v3264_v46 }
 0x750   :  { %3267 = vmatpush3.bf16.msra.mxu0 %v3264_v46 }
 0x751   :  { %3263 = vmatpush3.bf16.msra.mxu1 %v3638_v63  ;;  %v3268_v63 = vpack.c.bf16 %v2417_v38, %v2416_v60 }
 0x753   :  { %3269 = vmatprep.subr.bf16.mxu0 %v3268_v63 }
 0x754   :  { %3059 = vmatmul.mubr.msk.f32.vlgmr.msra.gmra.mrb[26].mxu1 %vm344_vm9, %v3935_v54  ;;  %3271 = vmatpush3.bf16.msra.mxu0 %v3268_v63 }
 0x81f   :  { %v2184_v58 = vpop.f32.mrb[24].mxu1  ;;  %v2254_v59 = vpop.f32.mrb[24].mxu0 }
 0x820   :  { %v2259_v61 = vrot.slane %v2184_v58, 2  ;;  %v3038_v62 = vpop.f32.mrb[25].mxu1  ;;  %v3049_v0 = vpop.f32.mrb[25].mxu0  ;;  %v2269_v1 = vrot.slane %v2254_v59, 2 }
 0x822   :  { %v2261_v2 = vadd.f32 %v2259_v61, %v3662_v6  ;;  %v2271_v28 = vadd.f32 %v2269_v1, %v3660_v3 }
 0x824   :  { %v2578_v4 = vmul.f32 -1.442695, %v2261_v2  ;;  %v2579_v11 = vmul.f32 -1.442695, %v2271_v28 }
 0x826   :  { %3351 = vpow2.f32 %v2578_v4 }
 0x827   :  { %v2344_v9 = vpop.f32.mrb[26].mxu1  ;;  %3353 = vpow2.f32 %v2579_v11 }
 0x828   :  { %v3060_v34 = vpop.f32.mrb[27].mxu1  ;;  %v2345_v42 = vadd.f32 %v3678_v27, %v2344_v9 }
 0x82a   :  { %v2349_v18 = vrot.slane %v2345_v42, 2 }
 0x830   :  { %v3352_v13 = vpop.eup %3351 }
 0x831   :  { %v2265_v15 = vadd.f32 1.0, %v3352_v13  ;;  %v3354_v16 = vpop.eup %3353 }
 0x832   :  { %v2275_v17 = vadd.f32 1.0, %v3354_v16 }
 0x833   :  { %3355 = vrcp.f32 %v2265_v15 }
 0x834   :  { %3357 = vrcp.f32 %v2275_v17 }
 0x83d   :  { %v3356_v19 = vpop.eup %3355 }
 0x83e   :  { %v2351_v50 = vmul.f32 %v3356_v19, %v2349_v18  ;;  %v3358_v3 = vpop.eup %3357 }
 0x83f   :  { %v2354_v23 = vsub.f32 1.0, %v3358_v3  ;;  %v2358_v27 = vmul.f32 %v3358_v3, %v2356_v24 }
 0x840   :  { %v2352_v6 = vadd.f32 %v2351_v50, %v3673_v21  ;;  %v2373_v21 = vsel %vm343_vm6, %v3741_v30, %v3935_v54  ;;  %v2384_v30 = vsel %vm843_vm14, %v2383_v32, 0.0  ;;  %vm2407_vm14 = vcmask 1043456  }
 0x841   :  { %v2374_v10 = vsel %vm2109_vm12, %v2373_v21, 0.0  ;;  %v2400_v26 = vrot.slane %v2384_v30, 4 }
 0x842   :  { %3359 = vtanh.f32 %v2352_v6  ;;  %v2388_v45 = vrot.slane %v2374_v10, 6 }
 0x84c   :  { %v3360_v29 = vpop.eup %3359 }
 0x84d   :  { %v2355_v31 = vmul.f32 %v3360_v29, %v2354_v23 }
 0x84f   :  { %v2359_v35 = vadd.f32 %v2358_v27, %v2355_v31 }
 0x851   :  { %v2368_v8 = vrot.slane %v2359_v35, 6 }
 0x853   :  { %v2370_v33 = vsel %vm2366_vm15, %v2368_v8, %v3935_v54  ;;  %v2411_v54 = vsel %vm2405_vm0, %v2380_v25, %v2397_v14 }
 0x854   :  { %v2371_v44 = vsel %vm343_vm6, %v3694_v49, %v2370_v33  ;;  %v2385_v7 = vsel %vm343_vm6, %v2370_v33, %v3694_v49  ;;  %v2412_v56 = vsel %vm2407_vm14, %v2411_v54, %v2400_v26  ;;  %v2511_v49 = vmul.f32 0.01, %v2581_v39 }
 0x855   :  { %v2372_v20 = vsel %vm2365_vm4, %v2371_v44, 0.0  ;;  %v2386_v48 = vsel %vm590_vm7, %v2385_v7, 0.0  ;;  %vm2508_vm6 = vcmp.gt.f32.partialorder %v2581_v39, 0.0 }
 0x856   :  { %v2406_v51 = vsel %vm2405_vm0, %v2372_v20, %v2388_v45  ;;  %v2403_v53 = vrot.slane %v2386_v48, 2  ;;  %v2514_v41 = vsel %vm2508_vm6, %v2581_v39, %v2511_v49 }
 0x857   :  { %v2408_v55 = vsel %vm2407_vm14, %v2406_v51, %v2391_v47  ;;  %2517 = vst.msk [vmem:[#allocation2 + $0x10] sm:$0xff] %vm344_vm9, %v2514_v41 }
 0x858   :  { %v2410_v60 = vsel %vm2409_vm1, %v2408_v55, %v2394_v52  ;;  %v2413_v46 = vsel %vm2409_vm1, %v2412_v56, %v2403_v53 }
 0x859   :  { %3069 = vmatprep.mubr.msk.f32.mxu0 %vm344_vm9, %v2410_v60 }
 0x85a   :  { %3070 = vmatmul.mubr.msk.f32.vlgmr.msra.gmra.mrb[26].mxu0 %vm344_vm9, %v2413_v46 }
 0x92d   :  { %v3071_v38 = vpop.f32.mrb[26].mxu0 }
 0x92e   :  { %v2503_v63 = vadd.f32 %v3071_v38, %v2581_v39  ;;  %v2497_v58 = vpop.f32.mrb[27].mxu0 }
 0x92f   :  { %v2498_v59 = vadd.f32 %v2581_v39, %v2497_v58 }
 0x930   :  { %vm2507_vm7 = vcmp.gt.f32.partialorder %v2503_v63, 0.0  ;;  %v2510_v61 = vmul.f32 0.01, %v2503_v63 }
 0x931   :  { %vm2506_vm2 = vcmp.gt.f32.partialorder %v2498_v59, 0.0  ;;  %v2509_v62 = vmul.f32 0.01, %v2498_v59 }
 0x932   :  { %v2513_v0 = vsel %vm2507_vm7, %v2503_v63, %v2510_v61 }
 0x933   :  { %2516 = vst.msk [vmem:[#allocation2 + $0x8] sm:$0xff] %vm344_vm9, %v2513_v0  ;;  %v2512_v1 = vsel %vm2506_vm2, %v2498_v59, %v2509_v62 }
 0x934   :  { %2515 = vst.msk [vmem:[#allocation2] sm:$0xff] %vm344_vm9, %v2512_v1 }
 0x935   :  { %3372 = shalt.err (!%p3369_p4)
}
 0x936   :  { %s3373_s9 = scalar_lea.hbm %s4048_s14, 384 }
 0x937   :  { %p3374_p5 = scmp.ne.s32.totalorder %s4048_s14, %s3373_s9  ;;  %p3377_p6 = scmp.lt.u32.totalorder %s3373_s9, %s4048_s14 }
 0x939   :  { %p3379_p7 = pnand %p3377_p6, %p3374_p5 }
 0x93b   :  { %3382 = shalt.err (!%p3379_p7)
}
 0x93c   :  { %s3390_s30 = smov 128   ;;  %s3391_s15 = smov 8  }
 0x93d   :  { %2529 = dma.vmem_to_hbm [thread:$0]  %s2524_s25, 384, %s4048_s14, [#allocation3], %s3390_s30, %s3390_s30, %s3391_s15  }
 0x93e   :  { %3383 = dma.done.wait [#allocation3], 384  }
 0x93f   :  { %3384 = vsyncadd [#allocation3], 4294966912 }
 0x940   :  { %2533 = vsyncpa [#allocation3], 1 }

</bundles_post_ra>
